<compile_context>
chip_gen: v6e
topology: v6e:2x2x1
jax: 0.10.0
libtpu: 0.0.40
codegen_flags: <defaults>
</compile_context>

<pallas_src>
import functools

import jax
import jax.numpy as jnp
from jax.experimental import pallas as pl
from jax.experimental.pallas import tpu as pltpu


# ---------------------------------- tiling constants ----------------------------------

TILE_DST = 128     # dst-node tile (sublane axis of the running-max accumulator)
SRC_BLK = 128      # src-node block per grid step along the reduction (grid) axis
SUB = 8            # src rows processed per inner iteration
DST_CHUNK = 32     # dst columns per inner chunk -> 3-D temp is [8, 32, 128] = 32 vregs


def _rup(n, m):
    return ((n + m - 1) // m) * m


def _pad2(a, rows, cols):
    return jnp.pad(a, ((0, rows - a.shape[0]), (0, cols - a.shape[1])))


# ----------------------------- SAGEConv ('pool') kernel -----------------------------

def sage_conv_kernel(x_self_ref, x_src_ref, adjT_ref, wp_ref, bp_ref,
                     ws_ref, wn_ref, b_ref, out_ref,
                     acc_ref, pool_ref, adjf_ref, *, apply_elu, sub, dst_chunk):
    """Grid = (dst tiles ["parallel"], src blocks ["arbitrary", iterated last]).

    x_self_ref : [TILE_DST, Fin]     dst-tile rows of x (resident across src blocks)
    x_src_ref  : [SRC_BLK, Fin]      src-block rows of x (streamed)
    adjT_ref   : [SRC_BLK, TILE_DST] int8, adjT[src, dst] = 1 iff edge src->dst
    wp_ref     : [Fin, Fin]  fc_pool weight, bp_ref : [1, Fin]  fc_pool bias
    ws_ref     : [Fin, Fout] fc_self weight, wn_ref : [Fin, Fout] fc_neigh weight
    b_ref      : [1, Fout]   bias
    out_ref    : [TILE_DST, Fout]    written only on the last src block
    acc_ref    : [TILE_DST, Fin]     VMEM running max of masked relu(fc_pool(x_src))
    pool_ref   : [SRC_BLK, Fin]      VMEM scratch for the pooled src block
    adjf_ref   : [SRC_BLK, TILE_DST] VMEM f32 copy of the int8 adjacency block
    """
    f32 = jnp.float32
    s = pl.program_id(1)

    @pl.when(s == 0)
    def _init():
        # zero init matches DGL's zero-fill for zero-in-degree nodes; exact because
        # the pooled values are post-ReLU (>= 0).
        acc_ref[...] = jnp.zeros_like(acc_ref)

    # fc_pool on this src block (MXU), kept in VMEM scratch for cheap re-slicing.
    pool_ref[...] = jnp.maximum(
        jnp.dot(x_src_ref[...], wp_ref[...], preferred_element_type=f32)
        + bp_ref[...], 0.0)
    # int8 adjacency block -> f32 once per grid step; all inner slicing is then on f32.
    adjf_ref[...] = adjT_ref[...].astype(f32)

    src_blk, tile_dst = adjT_ref.shape
    fin = pool_ref.shape[1]
    num_sub = src_blk // sub
    ndc = tile_dst // dst_chunk

    def sub_body(j, carry):
        r0 = pl.multiple_of(j * sub, sub)
        a8 = adjf_ref[pl.ds(r0, sub), :]          # [sub, tile_dst]
        p8 = pool_ref[pl.ds(r0, sub), :]          # [sub, fin]
        for c in range(ndc):                      # static: small, bounded chunks
            d0 = c * dst_chunk
            a_c = a8[:, d0:d0 + dst_chunk]        # [sub, dst_chunk]
            # mask-by-multiply is exact: pooled >= 0 post-ReLU, adjacency is {0, 1};
            # the live 3-D temporary is [sub, dst_chunk, fin] = 32 vregs (no spill).
            term = a_c[:, :, None] * p8[:, None, :]
            m = jnp.max(term, axis=0)             # [dst_chunk, fin]
            cur = acc_ref[pl.ds(d0, dst_chunk), :]
            acc_ref[pl.ds(d0, dst_chunk), :] = jnp.maximum(cur, m)
        return carry

    jax.lax.fori_loop(0, num_sub, sub_body, 0)

    @pl.when(s == pl.num_programs(1) - 1)
    def _finalize():
        neigh = acc_ref[...]                      # [tile_dst, fin]
        # fc_self + fc_neigh as two dots summed (no lane concat relayout).
        h = (jnp.dot(x_self_ref[...], ws_ref[...], preferred_element_type=f32)
             + jnp.dot(neigh, wn_ref[...], preferred_element_type=f32)
             + b_ref[...])
        if apply_elu:
            h = jnp.where(h > 0, h, jnp.exp(jnp.minimum(h, 0.0)) - 1.0)  # ELU(alpha=1)
        out_ref[...] = h


def _sage_conv(x, adjT_i8, wp, bp, ws, wn, b, *, apply_elu):
    n, fin = x.shape
    fout = ws.shape[1]
    assert n % TILE_DST == 0 and n % SRC_BLK == 0
    assert fin % 128 == 0 and fout % 128 == 0

    kernel = functools.partial(sage_conv_kernel, apply_elu=apply_elu,
                               sub=SUB, dst_chunk=DST_CHUNK)
    return pl.pallas_call(
        kernel,
        out_shape=jax.ShapeDtypeStruct((n, fout), jnp.float32),
        grid_spec=pltpu.PrefetchScalarGridSpec(
            num_scalar_prefetch=0,
            grid=(n // TILE_DST, n // SRC_BLK),
            in_specs=[
                pl.BlockSpec((TILE_DST, fin), lambda i, s: (i, 0)),       # x_self (resident)
                pl.BlockSpec((SRC_BLK, fin), lambda i, s: (s, 0)),        # x_src (streamed)
                pl.BlockSpec((SRC_BLK, TILE_DST), lambda i, s: (s, i)),   # adjT int8 tile
                pl.BlockSpec((fin, fin), lambda i, s: (0, 0)),            # fc_pool W
                pl.BlockSpec((1, fin), lambda i, s: (0, 0)),              # fc_pool b
                pl.BlockSpec((fin, fout), lambda i, s: (0, 0)),           # fc_self W
                pl.BlockSpec((fin, fout), lambda i, s: (0, 0)),           # fc_neigh W
                pl.BlockSpec((1, fout), lambda i, s: (0, 0)),             # bias
            ],
            out_specs=pl.BlockSpec((TILE_DST, fout), lambda i, s: (i, 0)),
            scratch_shapes=[
                pltpu.VMEM((TILE_DST, fin), jnp.float32),      # running-max accumulator
                pltpu.VMEM((SRC_BLK, fin), jnp.float32),       # pooled src block
                pltpu.VMEM((SRC_BLK, TILE_DST), jnp.float32),  # f32 adjacency block
            ],
        ),
        compiler_params=pltpu.CompilerParams(
            dimension_semantics=("parallel", "arbitrary"),
            vmem_limit_bytes=32 * 1024 * 1024),
    )(x, x, adjT_i8, wp, bp, ws, wn, b)


# ------------------------------- EdgePredictor kernel -------------------------------

def edge_predictor_kernel(ef_ref, gsrc_ref, gdst_ref, wef_ref, bef_ref,
                          wpe_ref, bpr1_ref, wpr2_ref, bpr2_ref, out_ref,
                          *, num_classes, out_width):
    """One tile of edges. gsrc/gdst are the node-level projections h2 @ Wpr1_{src,dst}
    gathered in the wrapper, so per-edge cost is independent of the graph size."""
    f32 = jnp.float32
    te = ef_ref.shape[0]

    eh = jnp.maximum(
        jnp.dot(ef_ref[...], wef_ref[...], preferred_element_type=f32)
        + bef_ref[...], 0.0)                                        # [te, HE]
    p = jnp.maximum(
        jnp.dot(eh, wpe_ref[...], preferred_element_type=f32)
        + gsrc_ref[...] + gdst_ref[...] + bpr1_ref[...], 0.0)       # [te, HP]
    # BN2 already folded into wpr2 / bpr2.
    logits = jnp.maximum(
        jnp.dot(p, wpr2_ref[...], preferred_element_type=f32) + bpr2_ref[...], 0.0)

    z = logits - jnp.max(logits, axis=1, keepdims=True)
    logp = z - jnp.log(jnp.sum(jnp.exp(z), axis=1, keepdims=True))
    # Padded edge rows (zero features / zero projections) flow through the same math;
    # everything stays finite and they are sliced off in the wrapper.
    out_ref[...] = jnp.concatenate(
        [logp, jnp.zeros((te, out_width - num_classes), f32)], axis=1)   # lane-dense store


def _edge_predict(efeat, gsrc, gdst, wef, bef, wpe, bpr1, wpr2, bpr2, num_classes):
    e, fe = efeat.shape
    hp = gsrc.shape[1]
    he = wef.shape[1]

    e_pad = _rup(max(e, 1), 128)
    te = 512 if e_pad % 512 == 0 else (256 if e_pad % 256 == 0 else 128)
    if e_pad != e:
        pad = e_pad - e
        efeat = jnp.pad(efeat, ((0, pad), (0, 0)))
        gsrc = jnp.pad(gsrc, ((0, pad), (0, 0)))
        gdst = jnp.pad(gdst, ((0, pad), (0, 0)))

    out_w = 128
    kernel = functools.partial(edge_predictor_kernel,
                               num_classes=num_classes, out_width=out_w)
    out = pl.pallas_call(
        kernel,
        out_shape=jax.ShapeDtypeStruct((e_pad, out_w), jnp.float32),
        grid_spec=pltpu.PrefetchScalarGridSpec(
            num_scalar_prefetch=0,
            grid=(e_pad // te,),
            in_specs=[
                pl.BlockSpec((te, fe), lambda i: (i, 0)),       # edge features
                pl.BlockSpec((te, hp), lambda i: (i, 0)),       # gathered src projection
                pl.BlockSpec((te, hp), lambda i: (i, 0)),       # gathered dst projection
                pl.BlockSpec(wef.shape, lambda i: (0, 0)),
                pl.BlockSpec((1, he), lambda i: (0, 0)),
                pl.BlockSpec(wpe.shape, lambda i: (0, 0)),
                pl.BlockSpec((1, hp), lambda i: (0, 0)),
                pl.BlockSpec(wpr2.shape, lambda i: (0, 0)),
                pl.BlockSpec((1, num_classes), lambda i: (0, 0)),
            ],
            out_specs=pl.BlockSpec((te, out_w), lambda i: (i, 0)),
        ),
        compiler_params=pltpu.CompilerParams(
            dimension_semantics=("parallel",),
            vmem_limit_bytes=32 * 1024 * 1024),
    )(efeat, gsrc, gdst, wef, bef, wpe, bpr1, wpr2, bpr2)
    return out[:e, :num_classes]


# ----------------------------------- full forward -----------------------------------

def sage_forward(params, x, adj, src_idx, dst_idx, efeat, num_classes, eps=1e-5):
    n, f0 = x.shape
    h1 = params["ws1"].shape[1]        # 64
    h2 = params["ws2"].shape[1]        # 16
    he = params["wef"].shape[1]        # 8
    hp = params["wpr1"].shape[1]       # 16

    # ---- fold eval-mode BatchNorm1d(64) into the layer-2 linears (exact algebra) ----
    s1 = params["g1"] / jnp.sqrt(params["rv1"] + eps)
    t1 = params["be1"] - params["rm1"] * s1
    wp2f = s1.T * params["wp2"]
    bp2f = params["bp2"] + t1 @ params["wp2"]
    ws2f = s1.T * params["ws2"]
    b2f = params["b2"] + t1 @ params["ws2"]
    # ---- fold eval-mode BatchNorm1d(16) into the predictor output linear ----
    s2 = params["g2"] / jnp.sqrt(params["rv2"] + eps)
    t2 = params["be2"] - params["rm2"] * s2
    wpr2f = s2.T * params["wpr2"]
    bpr2f = params["bpr2"] + t2 @ params["wpr2"]

    # ---- hoist the predictor's h_src / h_dst projections to the node level by
    #      folding Wpr1 blocks into the layer-2 output linears ----
    wpe = params["wpr1"][:he]                   # edge-feature branch of Wpr1
    wsrc = params["wpr1"][he:he + h2]
    wdst = params["wpr1"][he + h2:]
    ws2p = jnp.concatenate([ws2f @ wsrc, ws2f @ wdst], axis=1)            # [H1, 2*HP]
    wn2p = jnp.concatenate([params["wn2"] @ wsrc, params["wn2"] @ wdst], axis=1)
    b2p = jnp.concatenate([b2f @ wsrc, b2f @ wdst], axis=1)               # [1, 2*HP]

    # ---- pad nodes / feature dims to lane-dense multiples of 128 ----
    n_pad = _rup(n, 128)
    f0p = _rup(f0, 128)
    h1p = _rup(h1, 128)
    p2p = _rup(2 * hp, 128)

    xp = jnp.pad(x, ((0, n_pad - n), (0, f0p - f0)))
    adjT = jnp.pad(adj.T, ((0, n_pad - n), (0, n_pad - n))).astype(jnp.int8)

    wp1 = _pad2(params["wp1"], f0p, f0p); bp1 = _pad2(params["bp1"], 1, f0p)
    ws1 = _pad2(params["ws1"], f0p, h1p); wn1 = _pad2(params["wn1"], f0p, h1p)
    b1 = _pad2(params["b1"], 1, h1p)
    wp2 = _pad2(wp2f, h1p, h1p); bp2 = _pad2(bp2f, 1, h1p)
    ws2 = _pad2(ws2p, h1p, p2p); wn2 = _pad2(wn2p, h1p, p2p)
    b2 = _pad2(b2p, 1, p2p)

    # layer 1 (ELU) and layer 2 (no activation, outputs [h2@Wsrc | h2@Wdst] per node)
    h1_nodes = _sage_conv(xp, adjT, wp1, bp1, ws1, wn1, b1, apply_elu=True)
    proj = _sage_conv(h1_nodes, adjT, wp2, bp2, ws2, wn2, b2, apply_elu=False)

    # true row gather of the node-level projections (per-edge cost independent of N)
    gsrc = jnp.take(proj[:, :hp], src_idx, axis=0)
    gdst = jnp.take(proj[:, hp:2 * hp], dst_idx, axis=0)

    return _edge_predict(efeat, gsrc, gdst, params["wef"], params["bef"],
                         wpe, params["bpr1"], wpr2f, bpr2f, num_classes)


# ------------------------- pure-JAX reference (correctness) -------------------------

def _elu(x):
    return jnp.where(x > 0, x, jnp.exp(jnp.minimum(x, 0.0)) - 1.0)


def _bn_eval(x, gamma, beta, mean, var, eps=1e-5):
    return (x - mean) * gamma * jax.lax.rsqrt(var + eps) + beta


def ref_forward(params, x, adj, src_idx, dst_idx, efeat):
    pool1 = jnp.maximum(x @ params["wp1"] + params["bp1"], 0.0)
    neigh1 = jnp.max(adj[:, :, None] * pool1[None, :, :], axis=1)
    h1 = _elu(x @ params["ws1"] + neigh1 @ params["wn1"] + params["b1"])
    h1 = _bn_eval(h1, params["g1"], params["be1"], params["rm1"], params["rv1"])
    pool2 = jnp.maximum(h1 @ params["wp2"] + params["bp2"], 0.0)
    neigh2 = jnp.max(adj[:, :, None] * pool2[None, :, :], axis=1)
    h2 = h1 @ params["ws2"] + neigh2 @ params["wn2"] + params["b2"]
    eh = jnp.maximum(efeat @ params["wef"] + params["bef"], 0.0)
    h = jnp.concatenate([eh, h2[src_idx], h2[dst_idx]], axis=1)
    p = jnp.maximum(h @ params["wpr1"] + params["bpr1"], 0.0)
    p = _bn_eval(p, params["g2"], params["be2"], params["rm2"], params["rv2"])
    logits = jnp.maximum(p @ params["wpr2"] + params["bpr2"], 0.0)
    return jax.nn.log_softmax(logits, axis=1)


# ------------------------------------------ main ------------------------------------

if __name__ == "__main__":
    N = 16            # nodes
    E = 24            # edges
    F0 = 4            # node_feature_size
    Fe = 6            # edge_feature_size
    C = 4             # num_classes
    H1, H2 = 64, 16   # SAGEConv output sizes
    HE = 8            # EdgePredictor hidden_size
    HP = 2 * HE       # predictor hidden (= 16)
    CAT = HE + 2 * H2 # 8 + 32 = 40

    key = jax.random.PRNGKey(0)
    keys = jax.random.split(key, 32)
    ki = iter(range(32))

    def w(shape, scale=0.1):
        return (scale * jax.random.normal(keys[next(ki)], shape)).astype(jnp.float32)

    params = {
        # SAGEConv 1 (in=F0, out=64, pool)
        "wp1": w((F0, F0)), "bp1": w((1, F0)),
        "ws1": w((F0, H1)), "wn1": w((F0, H1)), "b1": w((1, H1)),
        # BatchNorm1d(64) eval-mode params (randomized to exercise the folding)
        "g1": 1.0 + w((1, H1)), "be1": w((1, H1)), "rm1": w((1, H1)),
        "rv1": jax.random.uniform(keys[next(ki)], (1, H1), jnp.float32, 0.5, 1.5),
        # SAGEConv 2 (in=64, out=16, pool)
        "wp2": w((H1, H1)), "bp2": w((1, H1)),
        "ws2": w((H1, H2)), "wn2": w((H1, H2)), "b2": w((1, H2)),
        # EdgePredictor.edge_feature: Linear(Fe -> 8)
        "wef": w((Fe, HE)), "bef": w((1, HE)),
        # predictor Linear(40 -> 16)
        "wpr1": w((CAT, HP)), "bpr1": w((1, HP)),
        # BatchNorm1d(16)
        "g2": 1.0 + w((1, HP)), "be2": w((1, HP)), "rm2": w((1, HP)),
        "rv2": jax.random.uniform(keys[next(ki)], (1, HP), jnp.float32, 0.5, 1.5),
        # predictor Linear(16 -> C)
        "wpr2": w((HP, C)), "bpr2": w((1, C)),
    }

    # Deterministic synthetic graph: ring (every node has an in-edge) + 8 chords.
    src_idx = jnp.concatenate([jnp.arange(N), jnp.arange(8)]).astype(jnp.int32)
    dst_idx = jnp.concatenate([(jnp.arange(N) + 1) % N, (jnp.arange(8) + 5) % N]).astype(jnp.int32)
    adj = jnp.zeros((N, N), jnp.float32).at[dst_idx, src_idx].set(1.0)   # adj[dst, src]

    kx, ke = jax.random.split(jax.random.PRNGKey(1))
    n_feats = jax.random.normal(kx, (N, F0), jnp.float32)
    e_feats = jax.random.normal(ke, (E, Fe), jnp.float32)

    out = sage_forward(params, n_feats, adj, src_idx, dst_idx, e_feats, C)
    out = jax.block_until_ready(out)

    ref = ref_forward(params, n_feats, adj, src_idx, dst_idx, e_feats)
    assert out.shape == (E, C)
    assert jnp.allclose(out, ref, rtol=1e-4, atol=1e-4), "mismatch vs. JAX reference"

    print("KERNEL_OK")
</pallas_src>

<mosaic_0001>
module attributes {stable_mosaic.version = 11 : i64} {
  func.func @sage_conv_kernel(%arg0: i32, %arg1: i32, %arg2: memref<128x128xf32, #tpu.memory_space<vmem>>, %arg3: memref<128x128xf32, #tpu.memory_space<vmem>>, %arg4: memref<128x128xi8, #tpu.memory_space<vmem>>, %arg5: memref<128x128xf32, #tpu.memory_space<vmem>>, %arg6: memref<1x128xf32, #tpu.memory_space<vmem>>, %arg7: memref<128x128xf32, #tpu.memory_space<vmem>>, %arg8: memref<128x128xf32, #tpu.memory_space<vmem>>, %arg9: memref<1x128xf32, #tpu.memory_space<vmem>>, %arg10: memref<128x128xf32, #tpu.memory_space<vmem>>, %arg11: memref<128x128xf32, #tpu.memory_space<vmem>>, %arg12: memref<128x128xf32, #tpu.memory_space<vmem>>, %arg13: memref<128x128xf32, #tpu.memory_space<vmem>>) attributes {dimension_semantics = [#tpu.dimension_semantics<parallel>, #tpu.dimension_semantics<arbitrary>], iteration_bounds = array<i64: 1, 1>, scalar_prefetch = 0 : i64, scratch_operands = 3 : i64, tpu.core_type = #tpu.core_type<tc>, window_params = [{transform_indices = @transform_0, window_bounds = array<i64: 128, 128>}, {transform_indices = @transform_1, window_bounds = array<i64: 128, 128>}, {transform_indices = @transform_2, window_bounds = array<i64: 128, 128>}, {pipeline_mode = #tpu.pipeline_mode<synchronous>, transform_indices = @transform_3, window_bounds = array<i64: 128, 128>}, {pipeline_mode = #tpu.pipeline_mode<synchronous>, transform_indices = @transform_4, window_bounds = array<i64: 1, 128>}, {pipeline_mode = #tpu.pipeline_mode<synchronous>, transform_indices = @transform_5, window_bounds = array<i64: 128, 128>}, {pipeline_mode = #tpu.pipeline_mode<synchronous>, transform_indices = @transform_6, window_bounds = array<i64: 128, 128>}, {pipeline_mode = #tpu.pipeline_mode<synchronous>, transform_indices = @transform_7, window_bounds = array<i64: 1, 128>}, {transform_indices = @transform_8, window_bounds = array<i64: 128, 128>}]} {
    %c0_i32 = arith.constant 0 : i32
    %0 = arith.cmpi eq, %arg1, %c0_i32 : i32
    %1 = arith.extui %0 : i1 to i32
    %c0_i32_0 = arith.constant 0 : i32
    %2 = arith.cmpi ne, %1, %c0_i32_0 : i32
    scf.if %2 {
      %cst_17 = arith.constant 0.000000e+00 : f32
      %19 = vector.broadcast %cst_17 : f32 to vector<128x128xf32>
      %c0_18 = arith.constant 0 : index
      %c0_19 = arith.constant 0 : index
      %20 = vector.load %arg11[%c0_18, %c0_19] : memref<128x128xf32, #tpu.memory_space<vmem>>, vector<128x128xf32>
      tpu.vector_store %arg11[%c0_18, %c0_19], %19 {strides = array<i32>} : memref<128x128xf32, #tpu.memory_space<vmem>>, vector<128x128xf32>,
    } else {
    }
    %c0 = arith.constant 0 : index
    %c0_1 = arith.constant 0 : index
    %3 = vector.load %arg3[%c0, %c0_1] : memref<128x128xf32, #tpu.memory_space<vmem>>, vector<128x128xf32>
    %c0_2 = arith.constant 0 : index
    %c0_3 = arith.constant 0 : index
    %4 = vector.load %arg5[%c0_2, %c0_3] : memref<128x128xf32, #tpu.memory_space<vmem>>, vector<128x128xf32>
    %cst = arith.constant dense<0.000000e+00> : vector<128x128xf32>
    %5 = tpu.matmul %3, %4, %cst {dimension_numbers = #tpu.dot_dimension_numbers<[1], [0], [0], [1], [0, 0, 1, 1], [], []>} : vector<128x128xf32>, vector<128x128xf32>, vector<128x128xf32> -> vector<128x128xf32>
    %c0_4 = arith.constant 0 : index
    %c0_5 = arith.constant 0 : index
    %6 = vector.load %arg6[%c0_4, %c0_5] : memref<1x128xf32, #tpu.memory_space<vmem>>, vector<1x128xf32>
    %7 = vector.broadcast %6 : vector<1x128xf32> to vector<128x128xf32>
    %8 = arith.addf %5, %7 : vector<128x128xf32>
    %cst_6 = arith.constant 0.000000e+00 : f32
    %9 = vector.broadcast %cst_6 : f32 to vector<128x128xf32>
    %10 = arith.maximumf %8, %9 : vector<128x128xf32>
    %c0_7 = arith.constant 0 : index
    %c0_8 = arith.constant 0 : index
    %11 = vector.load %arg12[%c0_7, %c0_8] : memref<128x128xf32, #tpu.memory_space<vmem>>, vector<128x128xf32>
    tpu.vector_store %arg12[%c0_7, %c0_8], %10 {strides = array<i32>} : memref<128x128xf32, #tpu.memory_space<vmem>>, vector<128x128xf32>,
    %c0_9 = arith.constant 0 : index
    %c0_10 = arith.constant 0 : index
    %12 = vector.load %arg4[%c0_9, %c0_10] : memref<128x128xi8, #tpu.memory_space<vmem>>, vector<128x128xi8>
    %13 = arith.sitofp %12 : vector<128x128xi8> to vector<128x128xf32>
    %c0_11 = arith.constant 0 : index
    %c0_12 = arith.constant 0 : index
    %14 = vector.load %arg13[%c0_11, %c0_12] : memref<128x128xf32, #tpu.memory_space<vmem>>, vector<128x128xf32>
    tpu.vector_store %arg13[%c0_11, %c0_12], %13 {strides = array<i32>} : memref<128x128xf32, #tpu.memory_space<vmem>>, vector<128x128xf32>,
    %c0_i32_13 = arith.constant 0 : i32
    %c16_i32 = arith.constant 16 : i32
    %15 = arith.addi %c0_i32_13, %c16_i32 : i32
    %c1_i32 = arith.constant 1 : i32
    scf.for %arg14 = %c0_i32_13 to %15 step %c1_i32  : i32 {
      %c8_i32 = arith.constant 8 : i32
      %19 = arith.muli %arg14, %c8_i32 : i32
      %20 = tpu.assume_multiple %19, 8 : i32
      %21 = arith.index_cast %20 : i32 to index
      %c0_17 = arith.constant 0 : index
      %22 = vector.load %arg13[%21, %c0_17] : memref<128x128xf32, #tpu.memory_space<vmem>>, vector<8x128xf32>
      %23 = arith.index_cast %20 : i32 to index
      %c0_18 = arith.constant 0 : index
      %24 = vector.load %arg12[%23, %c0_18] : memref<128x128xf32, #tpu.memory_space<vmem>>, vector<8x128xf32>
      %25 = vector.extract_strided_slice %22 {offsets = [0, 0], sizes = [8, 32], strides = [1, 1]} : vector<8x128xf32> to vector<8x32xf32>
      %26 = vector.shape_cast %25 : vector<8x32xf32> to vector<8x32x1xf32>
      %27 = vector.shape_cast %24 : vector<8x128xf32> to vector<8x1x128xf32>
      %28 = vector.broadcast %26 : vector<8x32x1xf32> to vector<8x32x128xf32>
      %29 = vector.broadcast %27 : vector<8x1x128xf32> to vector<8x32x128xf32>
      %30 = arith.mulf %28, %29 : vector<8x32x128xf32>
      %cst_19 = arith.constant dense<0xFF800000> : vector<32x128xf32>
      %31 = vector.multi_reduction <maximumf>, %30, %cst_19 [0] : vector<8x32x128xf32> to vector<32x128xf32>
      %c0_20 = arith.constant 0 : index
      %c0_21 = arith.constant 0 : index
      %32 = vector.load %arg11[%c0_20, %c0_21] : memref<128x128xf32, #tpu.memory_space<vmem>>, vector<32x128xf32>
      %33 = arith.maximumf %32, %31 : vector<32x128xf32>
      %c0_22 = arith.constant 0 : index
      %c0_23 = arith.constant 0 : index
      %34 = vector.load %arg11[%c0_22, %c0_23] : memref<128x128xf32, #tpu.memory_space<vmem>>, vector<32x128xf32>
      tpu.vector_store %arg11[%c0_22, %c0_23], %33 {strides = array<i32>} : memref<128x128xf32, #tpu.memory_space<vmem>>, vector<32x128xf32>,
      %35 = vector.extract_strided_slice %22 {offsets = [0, 32], sizes = [8, 32], strides = [1, 1]} : vector<8x128xf32> to vector<8x32xf32>
      %36 = vector.shape_cast %35 : vector<8x32xf32> to vector<8x32x1xf32>
      %37 = vector.shape_cast %24 : vector<8x128xf32> to vector<8x1x128xf32>
      %38 = vector.broadcast %36 : vector<8x32x1xf32> to vector<8x32x128xf32>
      %39 = vector.broadcast %37 : vector<8x1x128xf32> to vector<8x32x128xf32>
      %40 = arith.mulf %38, %39 : vector<8x32x128xf32>
      %cst_24 = arith.constant dense<0xFF800000> : vector<32x128xf32>
      %41 = vector.multi_reduction <maximumf>, %40, %cst_24 [0] : vector<8x32x128xf32> to vector<32x128xf32>
      %c32 = arith.constant 32 : index
      %c0_25 = arith.constant 0 : index
      %42 = vector.load %arg11[%c32, %c0_25] : memref<128x128xf32, #tpu.memory_space<vmem>>, vector<32x128xf32>
      %43 = arith.maximumf %42, %41 : vector<32x128xf32>
      %c32_26 = arith.constant 32 : index
      %c0_27 = arith.constant 0 : index
      %44 = vector.load %arg11[%c32_26, %c0_27] : memref<128x128xf32, #tpu.memory_space<vmem>>, vector<32x128xf32>
      tpu.vector_store %arg11[%c32_26, %c0_27], %43 {strides = array<i32>} : memref<128x128xf32, #tpu.memory_space<vmem>>, vector<32x128xf32>,
      %45 = vector.extract_strided_slice %22 {offsets = [0, 64], sizes = [8, 32], strides = [1, 1]} : vector<8x128xf32> to vector<8x32xf32>
      %46 = vector.shape_cast %45 : vector<8x32xf32> to vector<8x32x1xf32>
      %47 = vector.shape_cast %24 : vector<8x128xf32> to vector<8x1x128xf32>
      %48 = vector.broadcast %46 : vector<8x32x1xf32> to vector<8x32x128xf32>
      %49 = vector.broadcast %47 : vector<8x1x128xf32> to vector<8x32x128xf32>
      %50 = arith.mulf %48, %49 : vector<8x32x128xf32>
      %cst_28 = arith.constant dense<0xFF800000> : vector<32x128xf32>
      %51 = vector.multi_reduction <maximumf>, %50, %cst_28 [0] : vector<8x32x128xf32> to vector<32x128xf32>
      %c64 = arith.constant 64 : index
      %c0_29 = arith.constant 0 : index
      %52 = vector.load %arg11[%c64, %c0_29] : memref<128x128xf32, #tpu.memory_space<vmem>>, vector<32x128xf32>
      %53 = arith.maximumf %52, %51 : vector<32x128xf32>
      %c64_30 = arith.constant 64 : index
      %c0_31 = arith.constant 0 : index
      %54 = vector.load %arg11[%c64_30, %c0_31] : memref<128x128xf32, #tpu.memory_space<vmem>>, vector<32x128xf32>
      tpu.vector_store %arg11[%c64_30, %c0_31], %53 {strides = array<i32>} : memref<128x128xf32, #tpu.memory_space<vmem>>, vector<32x128xf32>,
      %55 = vector.extract_strided_slice %22 {offsets = [0, 96], sizes = [8, 32], strides = [1, 1]} : vector<8x128xf32> to vector<8x32xf32>
      %56 = vector.shape_cast %55 : vector<8x32xf32> to vector<8x32x1xf32>
      %57 = vector.shape_cast %24 : vector<8x128xf32> to vector<8x1x128xf32>
      %58 = vector.broadcast %56 : vector<8x32x1xf32> to vector<8x32x128xf32>
      %59 = vector.broadcast %57 : vector<8x1x128xf32> to vector<8x32x128xf32>
      %60 = arith.mulf %58, %59 : vector<8x32x128xf32>
      %cst_32 = arith.constant dense<0xFF800000> : vector<32x128xf32>
      %61 = vector.multi_reduction <maximumf>, %60, %cst_32 [0] : vector<8x32x128xf32> to vector<32x128xf32>
      %c96 = arith.constant 96 : index
      %c0_33 = arith.constant 0 : index
      %62 = vector.load %arg11[%c96, %c0_33] : memref<128x128xf32, #tpu.memory_space<vmem>>, vector<32x128xf32>
      %63 = arith.maximumf %62, %61 : vector<32x128xf32>
      %c96_34 = arith.constant 96 : index
      %c0_35 = arith.constant 0 : index
      %64 = vector.load %arg11[%c96_34, %c0_35] : memref<128x128xf32, #tpu.memory_space<vmem>>, vector<32x128xf32>
      tpu.vector_store %arg11[%c96_34, %c0_35], %63 {strides = array<i32>} : memref<128x128xf32, #tpu.memory_space<vmem>>, vector<32x128xf32>,
    }
    %c16_i32_14 = arith.constant 16 : i32
    %c0_i32_15 = arith.constant 0 : i32
    %16 = arith.cmpi eq, %arg1, %c0_i32_15 : i32
    %17 = arith.extui %16 : i1 to i32
    %c0_i32_16 = arith.constant 0 : i32
    %18 = arith.cmpi ne, %17, %c0_i32_16 : i32
    scf.if %18 {
      %c0_17 = arith.constant 0 : index
      %c0_18 = arith.constant 0 : index
      %19 = vector.load %arg11[%c0_17, %c0_18] : memref<128x128xf32, #tpu.memory_space<vmem>>, vector<128x128xf32>
      %c0_19 = arith.constant 0 : index
      %c0_20 = arith.constant 0 : index
      %20 = vector.load %arg2[%c0_19, %c0_20] : memref<128x128xf32, #tpu.memory_space<vmem>>, vector<128x128xf32>
      %c0_21 = arith.constant 0 : index
      %c0_22 = arith.constant 0 : index
      %21 = vector.load %arg7[%c0_21, %c0_22] : memref<128x128xf32, #tpu.memory_space<vmem>>, vector<128x128xf32>
      %cst_23 = arith.constant dense<0.000000e+00> : vector<128x128xf32>
      %22 = tpu.matmul %20, %21, %cst_23 {dimension_numbers = #tpu.dot_dimension_numbers<[1], [0], [0], [1], [0, 0, 1, 1], [], []>} : vector<128x128xf32>, vector<128x128xf32>, vector<128x128xf32> -> vector<128x128xf32>
      %c0_24 = arith.constant 0 : index
      %c0_25 = arith.constant 0 : index
      %23 = vector.load %arg8[%c0_24, %c0_25] : memref<128x128xf32, #tpu.memory_space<vmem>>, vector<128x128xf32>
      %cst_26 = arith.constant dense<0.000000e+00> : vector<128x128xf32>
      %24 = tpu.matmul %19, %23, %cst_26 {dimension_numbers = #tpu.dot_dimension_numbers<[1], [0], [0], [1], [0, 0, 1, 1], [], []>} : vector<128x128xf32>, vector<128x128xf32>, vector<128x128xf32> -> vector<128x128xf32>
      %25 = arith.addf %22, %24 : vector<128x128xf32>
      %c0_27 = arith.constant 0 : index
      %c0_28 = arith.constant 0 : index
      %26 = vector.load %arg9[%c0_27, %c0_28] : memref<1x128xf32, #tpu.memory_space<vmem>>, vector<1x128xf32>
      %27 = vector.broadcast %26 : vector<1x128xf32> to vector<128x128xf32>
      %28 = arith.addf %25, %27 : vector<128x128xf32>
      %cst_29 = arith.constant 0.000000e+00 : f32
      %29 = vector.broadcast %cst_29 : f32 to vector<128x128xf32>
      %30 = arith.cmpf ogt, %28, %29 : vector<128x128xf32>
      %cst_30 = arith.constant 0.000000e+00 : f32
      %31 = vector.broadcast %cst_30 : f32 to vector<128x128xf32>
      %32 = arith.minimumf %28, %31 : vector<128x128xf32>
      %33 = math.exp %32 : vector<128x128xf32>
      %cst_31 = arith.constant 1.000000e+00 : f32
      %34 = vector.broadcast %cst_31 : f32 to vector<128x128xf32>
      %35 = arith.subf %33, %34 : vector<128x128xf32>
      %36 = arith.select %30, %28, %35 : vector<128x128xi1>, vector<128x128xf32>
      %c0_32 = arith.constant 0 : index
      %c0_33 = arith.constant 0 : index
      %37 = vector.load %arg10[%c0_32, %c0_33] : memref<128x128xf32, #tpu.memory_space<vmem>>, vector<128x128xf32>
      tpu.vector_store %arg10[%c0_32, %c0_33], %36 {strides = array<i32>} : memref<128x128xf32, #tpu.memory_space<vmem>>, vector<128x128xf32>,
    } else {
    }
    return
  }
  func.func @transform_0(%arg0: i32, %arg1: i32) -> (i32, i32) {
    %c0_i32 = arith.constant 0 : i32
    %c0_i32_0 = arith.constant 0 : i32
    return %arg0, %c0_i32 : i32, i32
  }
  func.func @transform_1(%arg0: i32, %arg1: i32) -> (i32, i32) {
    %c0_i32 = arith.constant 0 : i32
    %c0_i32_0 = arith.constant 0 : i32
    return %arg1, %c0_i32 : i32, i32
  }
  func.func @transform_2(%arg0: i32, %arg1: i32) -> (i32, i32) {
    %c0_i32 = arith.constant 0 : i32
    return %arg1, %arg0 : i32, i32
  }
  func.func @transform_3(%arg0: i32, %arg1: i32) -> (i32, i32) {
    %c0_i32 = arith.constant 0 : i32
    %c0_i32_0 = arith.constant 0 : i32
    %c0_i32_1 = arith.constant 0 : i32
    return %c0_i32, %c0_i32_0 : i32, i32
  }
  func.func @transform_4(%arg0: i32, %arg1: i32) -> (i32, i32) {
    %c0_i32 = arith.constant 0 : i32
    %c0_i32_0 = arith.constant 0 : i32
    %c0_i32_1 = arith.constant 0 : i32
    return %c0_i32, %c0_i32_0 : i32, i32
  }
  func.func @transform_5(%arg0: i32, %arg1: i32) -> (i32, i32) {
    %c0_i32 = arith.constant 0 : i32
    %c0_i32_0 = arith.constant 0 : i32
    %c0_i32_1 = arith.constant 0 : i32
    return %c0_i32, %c0_i32_0 : i32, i32
  }
  func.func @transform_6(%arg0: i32, %arg1: i32) -> (i32, i32) {
    %c0_i32 = arith.constant 0 : i32
    %c0_i32_0 = arith.constant 0 : i32
    %c0_i32_1 = arith.constant 0 : i32
    return %c0_i32, %c0_i32_0 : i32, i32
  }
  func.func @transform_7(%arg0: i32, %arg1: i32) -> (i32, i32) {
    %c0_i32 = arith.constant 0 : i32
    %c0_i32_0 = arith.constant 0 : i32
    %c0_i32_1 = arith.constant 0 : i32
    return %c0_i32, %c0_i32_0 : i32, i32
  }
  func.func @transform_8(%arg0: i32, %arg1: i32) -> (i32, i32) {
    %c0_i32 = arith.constant 0 : i32
    %c0_i32_0 = arith.constant 0 : i32
    return %arg0, %c0_i32 : i32, i32
  }
}

</mosaic_0001>

<bundles_post_ra>
// kernel: tpu_custom_call.1
= control target key start
LH: loop header
LB: loop body
LE: loop exit
PB: predicated region body
PF: predicated region fallthrough
CT: control target
= control target key end

     0   :  { %13 = vsyncpa [#allocation6], 0  ;;  %s2964_s0 = inlined_call_operand.hbm [shape: f32[128,128], index: 0, kind: input, shape index: {}]   ;;  %s2965_s1 = inlined_call_operand.hbm [shape: f32[128,128], index: 1, kind: input, shape index: {}]   ;;  %s2966_s2 = inlined_call_operand.hbm [shape: s8[128,128], index: 2, kind: input, shape index: {}]   ;;  %s2967_s3 = inlined_call_operand.hbm [shape: f32[128,128], index: 3, kind: input, shape index: {}]   ;;  %s2968_s4 = inlined_call_operand.vmem [shape: f32[1,128], index: 4, kind: input, shape index: {}]   ;;  %s2969_s5 = inlined_call_operand.hbm [shape: f32[128,128], index: 5, kind: input, shape index: {}]   ;;  %s2970_s6 = inlined_call_operand.hbm [shape: f32[128,128], index: 6, kind: input, shape index: {}]   ;;  %s2971_s7 = inlined_call_operand.vmem [shape: f32[1,128], index: 7, kind: input, shape index: {}]   ;;  %s2972_s8 = inlined_call_operand.hbm [shape: f32[128,128], index: 8, kind: output, shape index: {}]  }
   0x1   :  { %14 = vsyncpa [#allocation9], 0 }
   0x2   :  { %15 = vsyncpa [#allocation12], 0 }
   0x3   :  { %16 = vsyncpa [#allocation15], 0 }
   0x4   :  { %17 = vsyncpa [#allocation7], 0  ;;  %s2371_s27 = smov [#allocation8]   ;;  %s2372_s29 = smov [#allocation11]  }
   0x5   :  { %s35_s28 = sshll.u32 %s2371_s27, 4  ;;  %s59_s30 = sshll.u32 %s2372_s29, 4  ;;  %s36_s28 = int_to_ptr.vmem [resolvable:$true] %s35_s28  ;;  %s60_s30 = int_to_ptr.vmem [resolvable:$true] %s59_s30 }
   0x6   :  { %s2221_s9 = scalar_lea.vmem %s36_s28, 2048  ;;  %p2226_p1 = scmp.lt.s32.totalorder %s36_s28, %s36_s28 }
   0x7   :  { %p2222_p0 = scmp.ne.s32.totalorder %s36_s28, %s2221_s9  ;;  %p2227_p2 = scmp.lt.s32.totalorder %s2221_s9, %s2221_s9 }
   0x9   :  { %p2228_p3 = por %p2227_p2, %p2226_p1 }
   0xb   :  { %p2229_p4 = pnand %p2228_p3, %p2222_p0 }
   0xd   :  { %2232 = shalt.err (!%p2229_p4)
}
   0xe   :  { %s2373_s10 = smov 128   ;;  %s2374_s11 = smov 8  }
   0xf   :  { %41 = dma.hbm_to_vmem [thread:$0]  %s2965_s1, 2048, %s36_s28, [#allocation9], %s2373_s10, %s2373_s10, %s2374_s11  }
  0x10   :  { %s2241_s14 = scalar_lea.vmem %s60_s30, 2048  ;;  %p2246_p6 = scmp.lt.s32.totalorder %s60_s30, %s60_s30 }
  0x11   :  { %p2242_p5 = scmp.ne.s32.totalorder %s60_s30, %s2241_s14  ;;  %p2247_p7 = scmp.lt.s32.totalorder %s2241_s14, %s2241_s14 }
  0x13   :  { %p2248_p8 = por %p2247_p7, %p2246_p6 }
  0x15   :  { %p2249_p9 = pnand %p2248_p8, %p2242_p5 }
  0x17   :  { %2252 = shalt.err (!%p2249_p9)
}
  0x18   :  { %65 = dma.hbm_to_vmem [thread:$0]  %s2967_s3, 2048, %s60_s30, [#allocation12], %s2373_s10, %s2373_s10, %s2374_s11  }
  0x19   :  { %s2375_s17 = smov [#allocation5]   ;;  %s2376_s19 = smov [#allocation10]  }
  0x1a   :  { %s23_s18 = sshll.u32 %s2375_s17, 4  ;;  %s47_s20 = sshll.u32 %s2376_s19, 4  ;;  %s24_s18 = int_to_ptr.vmem [resolvable:$true] %s23_s18  ;;  %s48_s20 = int_to_ptr.vmem [resolvable:$true] %s47_s20 }
  0x1b   :  { %s2261_s1 = scalar_lea.vmem %s24_s18, 2048  ;;  %p2266_p11 = scmp.lt.s32.totalorder %s24_s18, %s24_s18 }
  0x1c   :  { %p2262_p10 = scmp.ne.s32.totalorder %s24_s18, %s2261_s1  ;;  %p2267_p12 = scmp.lt.s32.totalorder %s2261_s1, %s2261_s1 }
  0x1e   :  { %p2268_p13 = por %p2267_p12, %p2266_p11 }
  0x20   :  { %p2269_p0 = pnand %p2268_p13, %p2262_p10 }
  0x22   :  { %2272 = shalt.err (!%p2269_p0)
}
  0x23   :  { %29 = dma.hbm_to_vmem [thread:$0]  %s2964_s0, 2048, %s24_s18, [#allocation6], %s2373_s10, %s2373_s10, %s2374_s11  }
  0x24   :  { %s2281_s3 = scalar_lea.vmem %s48_s20, 512  ;;  %p2286_p2 = scmp.lt.s32.totalorder %s48_s20, %s48_s20 }
  0x25   :  { %p2282_p1 = scmp.ne.s32.totalorder %s48_s20, %s2281_s3  ;;  %p2287_p3 = scmp.lt.s32.totalorder %s2281_s3, %s2281_s3 }
  0x27   :  { %p2288_p4 = por %p2287_p3, %p2286_p2 }
  0x29   :  { %p2289_p5 = pnand %p2288_p4, %p2282_p1 }
  0x2b   :  { %2292 = shalt.err (!%p2289_p5)
}
  0x2c   :  { %53 = dma.hbm_to_vmem [thread:$0]  %s2966_s2, 512, %s48_s20, [#allocation9], %s2373_s10, %s2373_s10, %s2374_s11  }
  0x2d   :  { %s2377_s25 = smov [#allocation13]   ;;  %s2378_s27 = smov [#allocation14]  }
  0x2e   :  { %s73_s26 = sshll.u32 %s2377_s25, 4  ;;  %s85_s28 = sshll.u32 %s2378_s27, 4  ;;  %s74_s26 = int_to_ptr.vmem [resolvable:$true] %s73_s26  ;;  %s86_s28 = int_to_ptr.vmem [resolvable:$true] %s85_s28 }
  0x2f   :  { %s2301_s0 = scalar_lea.vmem %s74_s26, 2048  ;;  %p2306_p7 = scmp.lt.s32.totalorder %s74_s26, %s74_s26 }
  0x30   :  { %p2302_p6 = scmp.ne.s32.totalorder %s74_s26, %s2301_s0  ;;  %p2307_p8 = scmp.lt.s32.totalorder %s2301_s0, %s2301_s0 }
  0x32   :  { %p2308_p9 = por %p2307_p8, %p2306_p7 }
  0x34   :  { %p2309_p10 = pnand %p2308_p9, %p2302_p6 }
  0x36   :  { %2312 = shalt.err (!%p2309_p10)
}
  0x37   :  { %79 = dma.hbm_to_vmem [thread:$0]  %s2969_s5, 2048, %s74_s26, [#allocation12], %s2373_s10, %s2373_s10, %s2374_s11  }
  0x38   :  { %s2321_s2 = scalar_lea.vmem %s86_s28, 2048  ;;  %p2326_p12 = scmp.lt.s32.totalorder %s86_s28, %s86_s28 }
  0x39   :  { %p2322_p11 = scmp.ne.s32.totalorder %s86_s28, %s2321_s2  ;;  %p2327_p13 = scmp.lt.s32.totalorder %s2321_s2, %s2321_s2 }
  0x3b   :  { %p2328_p0 = por %p2327_p13, %p2326_p12 }
  0x3d   :  { %p2329_p1 = pnand %p2328_p0, %p2322_p11 }
  0x3f   :  { %2332 = shalt.err (!%p2329_p1)
}
  0x40   :  { %91 = dma.hbm_to_vmem [thread:$0]  %s2970_s6, 2048, %s86_s28, [#allocation15], %s2373_s10, %s2373_s10, %s2374_s11  }
  0x41   :  { %2357 = dma.done.wait [#allocation6], 2048  }
  0x42   :  { %2358 = vsyncadd [#allocation6], 4294965248 }
  0x43   :  { %2359 = dma.done.wait [#allocation9], 2560  }
  0x44   :  { %2360 = vsyncadd [#allocation9], 4294964736 }
  0x45   :  { %2361 = dma.done.wait [#allocation12], 4096  }
  0x46   :  { %2362 = vsyncadd [#allocation12], 4294963200 }
  0x47   :  { %2363 = dma.done.wait [#allocation15], 2048  }
  0x48   :  { %2364 = vsyncadd [#allocation15], 4294965248  ;;  %v2379_v0 = vmov 0.0   ;;  %v348_v1 = vld [vmem:[#allocation10] sm:$0xff]  ;;  %v349_v2 = vld [vmem:[#allocation10 + $0x8] sm:$0xff] }
  0x49   :  { %116 = vst [vmem:[#allocation2 + $0x30] sm:$0xff] %v2379_v0  ;;  %117 = vst [vmem:[#allocation2] sm:$0xff] %v2379_v0  ;;  %v350_v3 = vld [vmem:[#allocation10 + $0x10] sm:$0xff]  ;;  %v351_v4 = vld [vmem:[#allocation10 + $0x18] sm:$0xff]  ;;  %v352_v5 = vunpack.c.0.s8 %v348_v1  ;;  %v353_v6 = vunpack.c.1.s8 %v348_v1  ;;  %v354_v7 = vunpack.c.2.s8 %v348_v1  ;;  %v355_v8 = vunpack.c.3.s8 %v348_v1 }
  0x4a   :  { %118 = vst [vmem:[#allocation2 + $0x58] sm:$0xff] %v2379_v0  ;;  %119 = vst [vmem:[#allocation2 + $0x18] sm:$0xff] %v2379_v0  ;;  %v163_v9 = vld [vmem:[#allocation11 + $0x78] sm:$0xff]  ;;  %v162_v10 = vld [vmem:[#allocation11 + $0x70] sm:$0xff]  ;;  %v356_v11 = vunpack.c.0.s8 %v349_v2  ;;  %v357_v12 = vunpack.c.1.s8 %v349_v2  ;;  %v358_v13 = vunpack.c.2.s8 %v349_v2  ;;  %v359_v14 = vunpack.c.3.s8 %v349_v2 }
  0x4b   :  { %120 = vst [vmem:[#allocation2 + $0x50] sm:$0xff] %v2379_v0  ;;  %121 = vst [vmem:[#allocation2 + $0x68] sm:$0xff] %v2379_v0  ;;  %1961 = vmatprep.subr.mxu0 %v163_v9  ;;  %v360_v15 = vunpack.c.0.s8 %v350_v3  ;;  %v361_v16 = vunpack.c.1.s8 %v350_v3  ;;  %v362_v17 = vunpack.c.2.s8 %v350_v3  ;;  %v363_v18 = vunpack.c.3.s8 %v350_v3  ;;  %v161_v19 = vld [vmem:[#allocation11 + $0x68] sm:$0xff]  ;;  %v160_v28 = vld [vmem:[#allocation11 + $0x60] sm:$0xff] }
  0x4c   :  { %122 = vst [vmem:[#allocation2 + $0x8] sm:$0xff] %v2379_v0  ;;  %123 = vst [vmem:[#allocation2 + $0x48] sm:$0xff] %v2379_v0  ;;  %1962 = vmatpush3.msra.mxu0 %v163_v9  ;;  %v364_v20 = vunpack.c.0.s8 %v351_v4  ;;  %v365_v21 = vunpack.c.1.s8 %v351_v4  ;;  %v366_v22 = vunpack.c.2.s8 %v351_v4  ;;  %v367_v23 = vunpack.c.3.s8 %v351_v4  ;;  %v132_v33 = vld [vmem:[#allocation8] sm:$0xff]  ;;  %v159_v38 = vld [vmem:[#allocation11 + $0x58] sm:$0xff] }
  0x4d   :  { %124 = vst [vmem:[#allocation2 + $0x40] sm:$0xff] %v2379_v0  ;;  %125 = vst [vmem:[#allocation2 + $0x20] sm:$0xff] %v2379_v0  ;;  %1963 = vmatprep.subr.mxu0 %v162_v10  ;;  %v368_v24 = vcvt.s32.f32 %v352_v5  ;;  %v369_v25 = vcvt.s32.f32 %v353_v6  ;;  %v370_v26 = vcvt.s32.f32 %v354_v7  ;;  %v371_v27 = vcvt.s32.f32 %v355_v8  ;;  %1993 = vmatprep.mubr.f32.mxu0 %v132_v33  ;;  %v158_v43 = vld [vmem:[#allocation11 + $0x50] sm:$0xff]  ;;  %v157_v44 = vld [vmem:[#allocation11 + $0x48] sm:$0xff] }
  0x4e   :  { %126 = vst [vmem:[#allocation2 + $0x10] sm:$0xff] %v2379_v0  ;;  %127 = vst [vmem:[#allocation2 + $0x38] sm:$0xff] %v2379_v0  ;;  %1964 = vmatpush3.msra.mxu0 %v162_v10  ;;  %v372_v29 = vcvt.s32.f32 %v356_v11  ;;  %v373_v30 = vcvt.s32.f32 %v357_v12  ;;  %v374_v31 = vcvt.s32.f32 %v358_v13  ;;  %v375_v32 = vcvt.s32.f32 %v359_v14  ;;  %v156_v45 = vld [vmem:[#allocation11 + $0x40] sm:$0xff]  ;;  %v155_v46 = vld [vmem:[#allocation11 + $0x38] sm:$0xff] }
  0x4f   :  { %128 = vst [vmem:[#allocation2 + $0x60] sm:$0xff] %v2379_v0  ;;  %129 = vst [vmem:[#allocation2 + $0x70] sm:$0xff] %v2379_v0  ;;  %1965 = vmatprep.subr.mxu0 %v161_v19  ;;  %v376_v34 = vcvt.s32.f32 %v360_v15  ;;  %v377_v35 = vcvt.s32.f32 %v361_v16  ;;  %v378_v36 = vcvt.s32.f32 %v362_v17  ;;  %v379_v37 = vcvt.s32.f32 %v363_v18  ;;  %v154_v47 = vld [vmem:[#allocation11 + $0x30] sm:$0xff]  ;;  %v153_v48 = vld [vmem:[#allocation11 + $0x28] sm:$0xff] }
  0x50   :  { %130 = vst [vmem:[#allocation2 + $0x78] sm:$0xff] %v2379_v0  ;;  %131 = vst [vmem:[#allocation2 + $0x28] sm:$0xff] %v2379_v0  ;;  %1966 = vmatpush3.msra.mxu0 %v161_v19  ;;  %v380_v39 = vcvt.s32.f32 %v364_v20  ;;  %v381_v40 = vcvt.s32.f32 %v365_v21  ;;  %v382_v41 = vcvt.s32.f32 %v366_v22  ;;  %v383_v42 = vcvt.s32.f32 %v367_v23  ;;  %v152_v49 = vld [vmem:[#allocation11 + $0x20] sm:$0xff]  ;;  %v151_v50 = vld [vmem:[#allocation11 + $0x18] sm:$0xff] }
  0x51   :  { %384 = vst [vmem:[#allocation4] sm:$0xff] %v368_v24  ;;  %385 = vst [vmem:[#allocation4 + $0x8] sm:$0xff] %v369_v25  ;;  %1967 = vmatprep.subr.mxu0 %v160_v28  ;;  %v150_v51 = vld [vmem:[#allocation11 + $0x10] sm:$0xff]  ;;  %v149_v52 = vld [vmem:[#allocation11 + $0x8] sm:$0xff] }
  0x52   :  { %386 = vst [vmem:[#allocation4 + $0x10] sm:$0xff] %v370_v26  ;;  %387 = vst [vmem:[#allocation4 + $0x18] sm:$0xff] %v371_v27  ;;  %1968 = vmatpush3.msra.mxu0 %v160_v28  ;;  %v148_v53 = vld [vmem:[#allocation11] sm:$0xff]  ;;  %v133_v54 = vld [vmem:[#allocation8 + $0x8] sm:$0xff] }
  0x53   :  { %388 = vst [vmem:[#allocation4 + $0x20] sm:$0xff] %v372_v29  ;;  %389 = vst [vmem:[#allocation4 + $0x28] sm:$0xff] %v373_v30  ;;  %1969 = vmatprep.subr.mxu0 %v159_v38  ;;  %v134_v55 = vld [vmem:[#allocation8 + $0x10] sm:$0xff]  ;;  %v135_v56 = vld [vmem:[#allocation8 + $0x18] sm:$0xff] }
  0x54   :  { %390 = vst [vmem:[#allocation4 + $0x30] sm:$0xff] %v374_v31  ;;  %391 = vst [vmem:[#allocation4 + $0x38] sm:$0xff] %v375_v32  ;;  %1970 = vmatpush3.msra.mxu0 %v159_v38  ;;  %v136_v57 = vld [vmem:[#allocation8 + $0x20] sm:$0xff]  ;;  %v137_v58 = vld [vmem:[#allocation8 + $0x28] sm:$0xff] }
  0x55   :  { %392 = vst [vmem:[#allocation4 + $0x40] sm:$0xff] %v376_v34  ;;  %393 = vst [vmem:[#allocation4 + $0x48] sm:$0xff] %v377_v35  ;;  %1971 = vmatprep.subr.mxu0 %v158_v43  ;;  %v138_v59 = vld [vmem:[#allocation8 + $0x30] sm:$0xff]  ;;  %v139_v60 = vld [vmem:[#allocation8 + $0x38] sm:$0xff] }
  0x56   :  { %394 = vst [vmem:[#allocation4 + $0x50] sm:$0xff] %v378_v36  ;;  %395 = vst [vmem:[#allocation4 + $0x58] sm:$0xff] %v379_v37  ;;  %1972 = vmatpush3.msra.mxu0 %v158_v43  ;;  %v140_v61 = vld [vmem:[#allocation8 + $0x40] sm:$0xff]  ;;  %v141_v62 = vld [vmem:[#allocation8 + $0x48] sm:$0xff] }
  0x57   :  { %396 = vst [vmem:[#allocation4 + $0x60] sm:$0xff] %v380_v39  ;;  %397 = vst [vmem:[#allocation4 + $0x68] sm:$0xff] %v381_v40  ;;  %1973 = vmatprep.subr.mxu0 %v157_v44  ;;  %v142_v63 = vld [vmem:[#allocation8 + $0x50] sm:$0xff]  ;;  %v143_v0 = vld [vmem:[#allocation8 + $0x58] sm:$0xff] }
  0x58   :  { %398 = vst [vmem:[#allocation4 + $0x70] sm:$0xff] %v382_v41  ;;  %399 = vst [vmem:[#allocation4 + $0x78] sm:$0xff] %v383_v42  ;;  %1974 = vmatpush3.msra.mxu0 %v157_v44  ;;  %v144_v1 = vld [vmem:[#allocation8 + $0x60] sm:$0xff]  ;;  %v145_v2 = vld [vmem:[#allocation8 + $0x68] sm:$0xff] }
  0x59   :  { %1975 = vmatprep.subr.mxu0 %v156_v45  ;;  %v146_v3 = vld [vmem:[#allocation8 + $0x70] sm:$0xff]  ;;  %v147_v4 = vld [vmem:[#allocation8 + $0x78] sm:$0xff]  ;;  %v1846_v5 = vld [vmem:[%s2968_s4] ss:$0 sm:$0xff]  ;;  %s2466_s4 = smov 0  }
  0x5a   :  { %1976 = vmatpush3.msra.mxu0 %v156_v45 }
  0x5b   :  { %1977 = vmatprep.subr.mxu0 %v155_v46 }
  0x5c   :  { %1978 = vmatpush3.msra.mxu0 %v155_v46 }
  0x5d   :  { %1979 = vmatprep.subr.mxu0 %v154_v47 }
  0x5e   :  { %1980 = vmatpush3.msra.mxu0 %v154_v47 }
  0x5f   :  { %1981 = vmatprep.subr.mxu0 %v153_v48 }
  0x60   :  { %1982 = vmatpush3.msra.mxu0 %v153_v48 }
  0x61   :  { %1983 = vmatprep.subr.mxu0 %v152_v49 }
  0x62   :  { %1984 = vmatpush3.msra.mxu0 %v152_v49 }
  0x63   :  { %1985 = vmatprep.subr.mxu0 %v151_v50 }
  0x64   :  { %1986 = vmatpush3.msra.mxu0 %v151_v50 }
  0x65   :  { %1987 = vmatprep.subr.mxu0 %v150_v51 }
  0x66   :  { %1988 = vmatpush3.msra.mxu0 %v150_v51 }
  0x67   :  { %1989 = vmatprep.subr.mxu0 %v149_v52 }
  0x68   :  { %1990 = vmatpush3.msra.mxu0 %v149_v52 }
  0x69   :  { %1991 = vmatprep.subr.mxu0 %v148_v53 }
  0x6a   :  { %1992 = vmatpush3.msra.mxu0 %v148_v53 }
  0x6b   :  { %1994 = vmatmul.mubr.f32.vlgmr.msra.gmra.mxu0 %v133_v54 }
  0x6c   :  { %1996 = vmatprep.mubr.f32.mxu0 %v134_v55 }
  0x6f   :  { %1997 = vmatmul.mubr.f32.gmra.mxu0 %v135_v56 }
  0x70   :  { %1999 = vmatprep.mubr.f32.mxu0 %v136_v57 }
  0x73   :  { %2000 = vmatmul.mubr.f32.gmra.mxu0 %v137_v58 }
  0x74   :  { %2002 = vmatprep.mubr.f32.mxu0 %v138_v59 }
  0x77   :  { %2003 = vmatmul.mubr.f32.gmra.mxu0 %v139_v60 }
  0x78   :  { %2005 = vmatprep.mubr.f32.mxu0 %v140_v61 }
  0x7b   :  { %2006 = vmatmul.mubr.f32.gmra.mxu0 %v141_v62 }
  0x7c   :  { %2008 = vmatprep.mubr.f32.mxu0 %v142_v63 }
  0x7f   :  { %2009 = vmatmul.mubr.f32.gmra.mxu0 %v143_v0 }
  0x80   :  { %2011 = vmatprep.mubr.f32.mxu0 %v144_v1 }
  0x83   :  { %2012 = vmatmul.mubr.f32.gmra.mxu0 %v145_v2 }
  0x84   :  { %2014 = vmatprep.mubr.f32.mxu0 %v146_v3 }
  0x87   :  { %2015 = vmatmul.mubr.f32.gmra.mxu0 %v147_v4 }
 0x12b   :  { %v1995_v6 = vpop.f32.mrf.mxu0 }
 0x12c   :  { %v243_v7 = vadd.f32 %v1995_v6, %v1846_v5 }
 0x12d   :  { %v237_v8 = vpop.f32.mrf.mxu0 }
 0x12e   :  { %v317_v9 = vmax.f32 %v243_v7, 0.0  ;;  %v238_v10 = vadd.f32 %v1846_v5, %v237_v8 }
 0x12f   :  { %v1998_v11 = vpop.f32.mrf.mxu0 }
 0x130   :  { %333 = vst [vmem:[#allocation3 + $0x8] sm:$0xff] %v317_v9  ;;  %v316_v12 = vmax.f32 %v238_v10, 0.0  ;;  %v253_v13 = vadd.f32 %v1998_v11, %v1846_v5 }
 0x131   :  { %v247_v14 = vpop.f32.mrf.mxu0 }
 0x132   :  { %332 = vst [vmem:[#allocation3] sm:$0xff] %v316_v12  ;;  %v319_v15 = vmax.f32 %v253_v13, 0.0  ;;  %v248_v16 = vadd.f32 %v1846_v5, %v247_v14 }
 0x133   :  { %v2001_v17 = vpop.f32.mrf.mxu0 }
 0x134   :  { %335 = vst [vmem:[#allocation3 + $0x18] sm:$0xff] %v319_v15  ;;  %v318_v18 = vmax.f32 %v248_v16, 0.0  ;;  %v263_v19 = vadd.f32 %v2001_v17, %v1846_v5 }
 0x135   :  { %v257_v20 = vpop.f32.mrf.mxu0 }
 0x136   :  { %334 = vst [vmem:[#allocation3 + $0x10] sm:$0xff] %v318_v18  ;;  %v321_v21 = vmax.f32 %v263_v19, 0.0  ;;  %v258_v22 = vadd.f32 %v1846_v5, %v257_v20 }
 0x137   :  { %v2004_v23 = vpop.f32.mrf.mxu0 }
 0x138   :  { %337 = vst [vmem:[#allocation3 + $0x28] sm:$0xff] %v321_v21  ;;  %v320_v24 = vmax.f32 %v258_v22, 0.0  ;;  %v273_v25 = vadd.f32 %v2004_v23, %v1846_v5 }
 0x139   :  { %v267_v26 = vpop.f32.mrf.mxu0 }
 0x13a   :  { %336 = vst [vmem:[#allocation3 + $0x20] sm:$0xff] %v320_v24  ;;  %v323_v27 = vmax.f32 %v273_v25, 0.0  ;;  %v268_v28 = vadd.f32 %v1846_v5, %v267_v26 }
 0x13b   :  { %v2007_v29 = vpop.f32.mrf.mxu0 }
 0x13c   :  { %339 = vst [vmem:[#allocation3 + $0x38] sm:$0xff] %v323_v27  ;;  %v322_v30 = vmax.f32 %v268_v28, 0.0  ;;  %v283_v31 = vadd.f32 %v2007_v29, %v1846_v5 }
 0x13d   :  { %v277_v32 = vpop.f32.mrf.mxu0 }
 0x13e   :  { %338 = vst [vmem:[#allocation3 + $0x30] sm:$0xff] %v322_v30  ;;  %v325_v33 = vmax.f32 %v283_v31, 0.0  ;;  %v278_v34 = vadd.f32 %v1846_v5, %v277_v32 }
 0x13f   :  { %v2010_v35 = vpop.f32.mrf.mxu0 }
 0x140   :  { %341 = vst [vmem:[#allocation3 + $0x48] sm:$0xff] %v325_v33  ;;  %v324_v36 = vmax.f32 %v278_v34, 0.0  ;;  %v293_v37 = vadd.f32 %v2010_v35, %v1846_v5 }
 0x141   :  { %v287_v38 = vpop.f32.mrf.mxu0 }
 0x142   :  { %340 = vst [vmem:[#allocation3 + $0x40] sm:$0xff] %v324_v36  ;;  %v327_v39 = vmax.f32 %v293_v37, 0.0  ;;  %v288_v40 = vadd.f32 %v1846_v5, %v287_v38 }
 0x143   :  { %v2013_v41 = vpop.f32.mrf.mxu0 }
 0x144   :  { %343 = vst [vmem:[#allocation3 + $0x58] sm:$0xff] %v327_v39  ;;  %v326_v42 = vmax.f32 %v288_v40, 0.0  ;;  %v303_v43 = vadd.f32 %v2013_v41, %v1846_v5 }
 0x145   :  { %v297_v44 = vpop.f32.mrf.mxu0 }
 0x146   :  { %342 = vst [vmem:[#allocation3 + $0x50] sm:$0xff] %v326_v42  ;;  %v329_v45 = vmax.f32 %v303_v43, 0.0  ;;  %v298_v46 = vadd.f32 %v1846_v5, %v297_v44 }
 0x147   :  { %v2016_v47 = vpop.f32.mrf.mxu0 }
 0x148   :  { %345 = vst [vmem:[#allocation3 + $0x68] sm:$0xff] %v329_v45  ;;  %v328_v48 = vmax.f32 %v298_v46, 0.0  ;;  %v313_v49 = vadd.f32 %v2016_v47, %v1846_v5 }
 0x149   :  { %v307_v50 = vpop.f32.mrf.mxu0 }
 0x14a   :  { %344 = vst [vmem:[#allocation3 + $0x60] sm:$0xff] %v328_v48  ;;  %v331_v51 = vmax.f32 %v313_v49, 0.0  ;;  %v308_v52 = vadd.f32 %v1846_v5, %v307_v50 }
 0x14c   :  { %347 = vst [vmem:[#allocation3 + $0x78] sm:$0xff] %v331_v51  ;;  %v330_v53 = vmax.f32 %v308_v52, 0.0 }
 0x14e   :  { %346 = vst [vmem:[#allocation3 + $0x70] sm:$0xff] %v330_v53 }
 0x14f LB: > { %v411_v54 = vlaneseq  ;;  %v2380_v55 = vmov 1966171168   ;;  %s1847_s13 = sshll.u32 %s2369_s4, 3  ;;  %s405_s4 = sadd.s32 1, %s2369_s4   ;;  %s2369_s4 = sphi %s2466_s4, %s405_s4  }
 0x150   : > { %v566_v56 = vunpack.c.l.s4 %v2380_v55  ;;  %s407_s14 = scalar_lea.vmem [#allocation4], %s1847_s13  ;;  %s409_s15 = scalar_lea.vmem [#allocation3], %s1847_s13 }
 0x151   : > { %v2472_v57 = vshrl.u32 %v411_v54, 7  ;;  %v2474_v58 = vld [vmem:[%s407_s14] sm:$0xff]  ;;  %p402_p2 = scmp.ge.s32.totalorder %s405_s4, 16  }
 0x152   : > { %v567_v60 = vunpack.c.0.s8 %v566_v56 }
 0x153   : > { %v413_v59 = vsub.s32 0, %v2472_v57  ;;  %v432_v63 = vsub.s32 1, %v2472_v57  ;;  %v451_v8 = vsub.s32 2, %v2472_v57  ;;  %v470_v17 = vsub.s32 3, %v2472_v57 }
 0x154   : > { %v570_v0 = vsub.s32 %v567_v60, %v2472_v57  ;;  %v489_v22 = vsub.s32 4, %v2472_v57  ;;  %v508_v26 = vsub.s32 5, %v2472_v57  ;;  %v527_v30 = vsub.s32 6, %v2472_v57 }
 0x155   : > { %v2478_v61 = vrot.slane %v2474_v58, %v413_v59  ;;  %v410_v62 = vld [vmem:[%s409_s15] sm:$0xff]  ;;  %v2487_v2 = vrot.slane %v2474_v58, %v432_v63  ;;  %v2503_v14 = vrot.slane %v2474_v58, %v451_v8  ;;  %v2513_v19 = vrot.slane %v2474_v58, %v470_v17 }
 0x156   : > { %v571_v1 = vrot.slane %v410_v62, %v570_v0  ;;  %v564_v13 = vcombine.high %v410_v62, %v410_v62  ;;  %v2523_v24 = vrot.slane %v2474_v58, %v489_v22  ;;  %v2533_v28 = vrot.slane %v2474_v58, %v508_v26 }
 0x157   : > { %424 = vbcast.lane.b32.xlu1 %v2478_v61, 272  ;;  %416 = vbcast.lane.b32.xlu0 %v2478_v61, 256  ;;  %v2543_v32 = vrot.slane %v2474_v58, %v527_v30  ;;  %v546_v33 = vsub.s32 7, %v2472_v57 }
 0x158   : > { %v587_v3 = vrot.slane %v571_v1, %v570_v0  ;;  %v579_v4 = vcombine.high %v571_v1, %v571_v1  ;;  %v578_v15 = vrot.slane %v564_v13, %v570_v0 }
 0x159   : > { %v2551_v34 = vrot.slane %v2474_v58, %v546_v33 }
 0x15a   : > { %v2489_v5 = vrot.slane %v587_v3, %v413_v59  ;;  %v601_v6 = vrot.slane %v579_v4, %v570_v0  ;;  %v609_v7 = vcombine.high %v587_v3, %v587_v3  ;;  %v594_v16 = vrot.slane %v578_v15, %v570_v0 }
 0x15b   : > { %428 = vbcast.lane.b32.xlu1 %v2478_v61, 280  ;;  %420 = vbcast.lane.b32.xlu0 %v2478_v61, 264  ;;  %v580_v20 = vcombine.high %v578_v15, %v578_v15 }
 0x15c   : > { %v2494_v9 = vrot.slane %v601_v6, %v413_v59  ;;  %v2496_v10 = vrot.slane %v609_v7, %v413_v59  ;;  %v611_v11 = vcombine.high %v601_v6, %v601_v6  ;;  %v2508_v18 = vrot.slane %v594_v16, %v413_v59 }
 0x15d   : > { %v608_v21 = vrot.slane %v580_v20, %v570_v0  ;;  %v610_v25 = vcombine.high %v594_v16, %v594_v16 }
 0x15e   : > { %v2498_v12 = vrot.slane %v611_v11, %v413_v59 }
 0x15f   : > { %439 = vbcast.lane.b32.xlu1 %v2487_v2, 264  ;;  %435 = vbcast.lane.b32.xlu0 %v2487_v2, 256  ;;  %v2518_v23 = vrot.slane %v608_v21, %v413_v59  ;;  %v2528_v27 = vrot.slane %v610_v25, %v413_v59  ;;  %v612_v29 = vcombine.high %v608_v21, %v608_v21 }
 0x161   : > { %v2538_v31 = vrot.slane %v612_v29, %v413_v59 }
 0x163   : > { %447 = vbcast.lane.b32.xlu1 %v2487_v2, 280  ;;  %443 = vbcast.lane.b32.xlu0 %v2487_v2, 272 }
 0x167   : > { %458 = vbcast.lane.b32.xlu1 %v2503_v14, 264  ;;  %454 = vbcast.lane.b32.xlu0 %v2503_v14, 256 }
 0x16b   : > { %466 = vbcast.lane.b32.xlu1 %v2503_v14, 280  ;;  %462 = vbcast.lane.b32.xlu0 %v2503_v14, 272 }
 0x16f   : > { %477 = vbcast.lane.b32.xlu1 %v2513_v19, 264  ;;  %473 = vbcast.lane.b32.xlu0 %v2513_v19, 256 }
 0x173   : > { %485 = vbcast.lane.b32.xlu1 %v2513_v19, 280  ;;  %481 = vbcast.lane.b32.xlu0 %v2513_v19, 272 }
 0x177   : > { %496 = vbcast.lane.b32.xlu1 %v2523_v24, 264  ;;  %492 = vbcast.lane.b32.xlu0 %v2523_v24, 256 }
 0x17b   : > { %504 = vbcast.lane.b32.xlu1 %v2523_v24, 280  ;;  %500 = vbcast.lane.b32.xlu0 %v2523_v24, 272 }
 0x17f   : > { %515 = vbcast.lane.b32.xlu1 %v2533_v28, 264  ;;  %511 = vbcast.lane.b32.xlu0 %v2533_v28, 256 }
 0x183   : > { %523 = vbcast.lane.b32.xlu1 %v2533_v28, 280  ;;  %519 = vbcast.lane.b32.xlu0 %v2533_v28, 272 }
 0x187   : > { %534 = vbcast.lane.b32.xlu1 %v2543_v32, 264  ;;  %530 = vbcast.lane.b32.xlu0 %v2543_v32, 256 }
 0x18b   : > { %542 = vbcast.lane.b32.xlu1 %v2543_v32, 280  ;;  %538 = vbcast.lane.b32.xlu0 %v2543_v32, 272 }
 0x18f   : > { %553 = vbcast.lane.b32.xlu1 %v2551_v34, 264  ;;  %549 = vbcast.lane.b32.xlu0 %v2551_v34, 256 }
 0x193   : > { %561 = vbcast.lane.b32.xlu1 %v2551_v34, 280  ;;  %557 = vbcast.lane.b32.xlu0 %v2551_v34, 272 }
 0x197   : > { %731 = vbcast.lane.b32.xlu1 %v2478_v61, 296  ;;  %727 = vbcast.lane.b32.xlu0 %v2478_v61, 288 }
 0x19b   : > { %739 = vbcast.lane.b32.xlu1 %v2478_v61, 312  ;;  %735 = vbcast.lane.b32.xlu0 %v2478_v61, 304 }
 0x19f   : > { %747 = vbcast.lane.b32.xlu1 %v2487_v2, 296  ;;  %743 = vbcast.lane.b32.xlu0 %v2487_v2, 288 }
 0x1a3   : > { %755 = vbcast.lane.b32.xlu1 %v2487_v2, 312  ;;  %751 = vbcast.lane.b32.xlu0 %v2487_v2, 304 }
 0x1a7   : > { %763 = vbcast.lane.b32.xlu1 %v2503_v14, 296  ;;  %759 = vbcast.lane.b32.xlu0 %v2503_v14, 288 }
 0x1ab   : > { %771 = vbcast.lane.b32.xlu1 %v2503_v14, 312  ;;  %767 = vbcast.lane.b32.xlu0 %v2503_v14, 304 }
 0x1af   : > { %779 = vbcast.lane.b32.xlu1 %v2513_v19, 296  ;;  %775 = vbcast.lane.b32.xlu0 %v2513_v19, 288 }
 0x1b3   : > { %787 = vbcast.lane.b32.xlu1 %v2513_v19, 312  ;;  %783 = vbcast.lane.b32.xlu0 %v2513_v19, 304 }
 0x1b7   : > { %795 = vbcast.lane.b32.xlu1 %v2523_v24, 296  ;;  %791 = vbcast.lane.b32.xlu0 %v2523_v24, 288 }
 0x1bb   : > { %803 = vbcast.lane.b32.xlu1 %v2523_v24, 312  ;;  %799 = vbcast.lane.b32.xlu0 %v2523_v24, 304 }
 0x1bf   : > { %811 = vbcast.lane.b32.xlu1 %v2533_v28, 296  ;;  %807 = vbcast.lane.b32.xlu0 %v2533_v28, 288 }
 0x1c3   : > { %819 = vbcast.lane.b32.xlu1 %v2533_v28, 312  ;;  %815 = vbcast.lane.b32.xlu0 %v2533_v28, 304 }
 0x1c7   : > { %827 = vbcast.lane.b32.xlu1 %v2543_v32, 296  ;;  %823 = vbcast.lane.b32.xlu0 %v2543_v32, 288 }
 0x1c9   : > { %v425_v35 = vpop.permute.xlu1 %424  ;;  %v417_v36 = vpop.permute.xlu0 %416 }
 0x1ca   : > { %v653_v63 = vmul.f32 %v2489_v5, %v417_v36  ;;  %v655_v16 = vmul.f32 %v2489_v5, %v425_v35 }
 0x1cb   : > { %835 = vbcast.lane.b32.xlu1 %v2543_v32, 312  ;;  %831 = vbcast.lane.b32.xlu0 %v2543_v32, 304 }
 0x1cd   : > { %v429_v37 = vpop.permute.xlu1 %428  ;;  %v421_v38 = vpop.permute.xlu0 %420 }
 0x1ce   : > { %v654_v0 = vmul.f32 %v2489_v5, %v421_v38  ;;  %v656_v4 = vmul.f32 %v2489_v5, %v429_v37 }
 0x1cf   : > { %843 = vbcast.lane.b32.xlu1 %v2551_v34, 296  ;;  %839 = vbcast.lane.b32.xlu0 %v2551_v34, 288 }
 0x1d1   : > { %v440_v39 = vpop.permute.xlu1 %439  ;;  %v436_v40 = vpop.permute.xlu0 %435 }
 0x1d2   : > { %v658_v57 = vmul.f32 %v2494_v9, %v440_v39  ;;  %v657_v58 = vmul.f32 %v2494_v9, %v436_v40 }
 0x1d3   : > { %851 = vbcast.lane.b32.xlu1 %v2551_v34, 312  ;;  %847 = vbcast.lane.b32.xlu0 %v2551_v34, 304 }
 0x1d4   : > { %v692_v8 = vmax.f32 %v654_v0, %v658_v57  ;;  %v685_v11 = vmax.f32 %v653_v63, %v657_v58 }
 0x1d5   : > { %v448_v41 = vpop.permute.xlu1 %447  ;;  %v444_v42 = vpop.permute.xlu0 %443 }
 0x1d6   : > { %v660_v59 = vmul.f32 %v2494_v9, %v448_v41  ;;  %v659_v6 = vmul.f32 %v2494_v9, %v444_v42 }
 0x1d7   : > { %931 = vbcast.lane.b32.xlu1 %v2478_v61, 328  ;;  %927 = vbcast.lane.b32.xlu0 %v2478_v61, 320 }
 0x1d8   : > { %v706_v17 = vmax.f32 %v656_v4, %v660_v59  ;;  %v699_v36 = vmax.f32 %v655_v16, %v659_v6 }
 0x1d9   : > { %v459_v43 = vpop.permute.xlu1 %458  ;;  %v455_v44 = vpop.permute.xlu0 %454 }
 0x1da   : > { %v662_v1 = vmul.f32 %v2496_v10, %v459_v43  ;;  %v661_v3 = vmul.f32 %v2496_v10, %v455_v44 }
 0x1db   : > { %939 = vbcast.lane.b32.xlu1 %v2478_v61, 344  ;;  %935 = vbcast.lane.b32.xlu0 %v2478_v61, 336 }
 0x1dc   : > { %v693_v26 = vmax.f32 %v692_v8, %v662_v1  ;;  %v686_v29 = vmax.f32 %v685_v11, %v661_v3  ;;  %v714_v8 = vld [vmem:[#allocation2] sm:$0xff]  ;;  %v713_v11 = vld [vmem:[#allocation2 + $0x30] sm:$0xff] }
 0x1dd   : > { %v467_v45 = vpop.permute.xlu1 %466  ;;  %v463_v46 = vpop.permute.xlu0 %462 }
 0x1de   : > { %v664_v7 = vmul.f32 %v2496_v10, %v467_v45  ;;  %v663_v20 = vmul.f32 %v2496_v10, %v463_v46 }
 0x1df   : > { %947 = vbcast.lane.b32.xlu1 %v2487_v2, 328  ;;  %943 = vbcast.lane.b32.xlu0 %v2487_v2, 320 }
 0x1e0   : > { %v707_v37 = vmax.f32 %v706_v17, %v664_v7  ;;  %v700_v42 = vmax.f32 %v699_v36, %v663_v20 }
 0x1e1   : > { %v478_v47 = vpop.permute.xlu1 %477  ;;  %v474_v48 = vpop.permute.xlu0 %473 }
 0x1e2   : > { %v666_v13 = vmul.f32 %v2498_v12, %v478_v47  ;;  %v665_v15 = vmul.f32 %v2498_v12, %v474_v48 }
 0x1e3   : > { %955 = vbcast.lane.b32.xlu1 %v2487_v2, 344  ;;  %951 = vbcast.lane.b32.xlu0 %v2487_v2, 336 }
 0x1e4   : > { %v694_v35 = vmax.f32 %v693_v26, %v666_v13  ;;  %v687_v39 = vmax.f32 %v686_v29, %v665_v15 }
 0x1e5   : > { %v486_v49 = vpop.permute.xlu1 %485  ;;  %v482_v50 = vpop.permute.xlu0 %481 }
 0x1e6   : > { %v668_v21 = vmul.f32 %v2498_v12, %v486_v49  ;;  %v667_v38 = vmul.f32 %v2498_v12, %v482_v50 }
 0x1e7   : > { %963 = vbcast.lane.b32.xlu1 %v2503_v14, 328  ;;  %959 = vbcast.lane.b32.xlu0 %v2503_v14, 320 }
 0x1e8   : > { %v708_v43 = vmax.f32 %v707_v37, %v668_v21 }
 0x1e9   : > { %v497_v51 = vpop.permute.xlu1 %496  ;;  %v493_v52 = vpop.permute.xlu0 %492 }
 0x1ea   : > { %v670_v30 = vmul.f32 %v2508_v18, %v497_v51  ;;  %v669_v33 = vmul.f32 %v2508_v18, %v493_v52  ;;  %v701_v52 = vmax.f32 %v700_v42, %v667_v38 }
 0x1eb   : > { %971 = vbcast.lane.b32.xlu1 %v2503_v14, 344  ;;  %967 = vbcast.lane.b32.xlu0 %v2503_v14, 336 }
 0x1ec   : > { %v695_v48 = vmax.f32 %v694_v35, %v670_v30  ;;  %v688_v49 = vmax.f32 %v687_v39, %v669_v33  ;;  %v716_v30 = vld [vmem:[#allocation2 + $0x18] sm:$0xff] }
 0x1ed   : > { %v505_v53 = vpop.permute.xlu1 %504  ;;  %v501_v54 = vpop.permute.xlu0 %500  ;;  %v715_v33 = vld [vmem:[#allocation2 + $0x58] sm:$0xff] }
 0x1ee   : > { %v672_v44 = vmul.f32 %v2508_v18, %v505_v53  ;;  %v671_v45 = vmul.f32 %v2508_v18, %v501_v54 }
 0x1ef   : > { %979 = vbcast.lane.b32.xlu1 %v2513_v19, 328  ;;  %975 = vbcast.lane.b32.xlu0 %v2513_v19, 320 }
 0x1f0   : > { %v709_v54 = vmax.f32 %v708_v43, %v672_v44  ;;  %v702_v58 = vmax.f32 %v701_v52, %v671_v45 }
 0x1f1   : > { %v516_v55 = vpop.permute.xlu1 %515  ;;  %v512_v56 = vpop.permute.xlu0 %511 }
 0x1f2   : > { %v674_v40 = vmul.f32 %v2518_v23, %v516_v55  ;;  %v673_v41 = vmul.f32 %v2518_v23, %v512_v56 }
 0x1f3   : > { %987 = vbcast.lane.b32.xlu1 %v2513_v19, 344  ;;  %983 = vbcast.lane.b32.xlu0 %v2513_v19, 336 }
 0x1f4   : > { %v696_v53 = vmax.f32 %v695_v48, %v674_v40  ;;  %v689_v56 = vmax.f32 %v688_v49, %v673_v41 }
 0x1f5   : > { %v524_v60 = vpop.permute.xlu1 %523  ;;  %v520_v62 = vpop.permute.xlu0 %519 }
 0x1f6   : > { %v676_v57 = vmul.f32 %v2518_v23, %v524_v60  ;;  %v675_v55 = vmul.f32 %v2518_v23, %v520_v62 }
 0x1f7   : > { %995 = vbcast.lane.b32.xlu1 %v2523_v24, 328  ;;  %991 = vbcast.lane.b32.xlu0 %v2523_v24, 320 }
 0x1f8   : > { %v710_v6 = vmax.f32 %v709_v54, %v676_v57  ;;  %v703_v7 = vmax.f32 %v702_v58, %v675_v55 }
 0x1f9   : > { %v535_v22 = vpop.permute.xlu1 %534  ;;  %v531_v25 = vpop.permute.xlu0 %530 }
 0x1fa   : > { %v678_v50 = vmul.f32 %v2528_v27, %v535_v22  ;;  %v677_v51 = vmul.f32 %v2528_v27, %v531_v25 }
 0x1fb   : > { %1003 = vbcast.lane.b32.xlu1 %v2523_v24, 344  ;;  %999 = vbcast.lane.b32.xlu0 %v2523_v24, 336 }
 0x1fc   : > { %v697_v3 = vmax.f32 %v696_v53, %v678_v50  ;;  %v690_v4 = vmax.f32 %v689_v56, %v677_v51 }
 0x1fd   : > { %v543_v46 = vpop.permute.xlu1 %542  ;;  %v539_v47 = vpop.permute.xlu0 %538 }
 0x1fe   : > { %v680_v59 = vmul.f32 %v2528_v27, %v543_v46  ;;  %v679_v63 = vmul.f32 %v2528_v27, %v539_v47 }
 0x1ff   : > { %1011 = vbcast.lane.b32.xlu1 %v2533_v28, 328  ;;  %1007 = vbcast.lane.b32.xlu0 %v2533_v28, 320 }
 0x200   : > { %v711_v16 = vmax.f32 %v710_v6, %v680_v59  ;;  %v704_v17 = vmax.f32 %v703_v7, %v679_v63 }
 0x201   : > { %v554_v0 = vpop.permute.xlu1 %553  ;;  %v550_v1 = vpop.permute.xlu0 %549 }
 0x202   : > { %v682_v60 = vmul.f32 %v2538_v31, %v554_v0  ;;  %v681_v62 = vmul.f32 %v2538_v31, %v550_v1 }
 0x203   : > { %1019 = vbcast.lane.b32.xlu1 %v2533_v28, 344  ;;  %1015 = vbcast.lane.b32.xlu0 %v2533_v28, 336 }
 0x204   : > { %v698_v13 = vmax.f32 %v697_v3, %v682_v60  ;;  %v691_v15 = vmax.f32 %v690_v4, %v681_v62 }
 0x205   : > { %v562_v20 = vpop.permute.xlu1 %561  ;;  %v558_v21 = vpop.permute.xlu0 %557 }
 0x206   : > { %v718_v22 = vmax.f32 %v714_v8, %v698_v13  ;;  %v717_v25 = vmax.f32 %v713_v11, %v691_v15  ;;  %v684_v26 = vmul.f32 %v2538_v31, %v562_v20  ;;  %v683_v29 = vmul.f32 %v2538_v31, %v558_v21 }
 0x207   : > { %1027 = vbcast.lane.b32.xlu1 %v2543_v32, 328  ;;  %1023 = vbcast.lane.b32.xlu0 %v2543_v32, 320 }
 0x208   : > { %722 = vst [vmem:[#allocation2] sm:$0xff] %v718_v22  ;;  %721 = vst [vmem:[#allocation2 + $0x30] sm:$0xff] %v717_v25  ;;  %v712_v36 = vmax.f32 %v711_v16, %v684_v26  ;;  %v705_v37 = vmax.f32 %v704_v17, %v683_v29 }
 0x209   : > { %v732_v38 = vpop.permute.xlu1 %731  ;;  %v728_v35 = vpop.permute.xlu0 %727 }
 0x20a   : > { %v720_v39 = vmax.f32 %v716_v30, %v712_v36  ;;  %v719_v40 = vmax.f32 %v715_v33, %v705_v37  ;;  %v854_v1 = vmul.f32 %v732_v38, %v2489_v5  ;;  %v853_v3 = vmul.f32 %v728_v35, %v2489_v5 }
 0x20b   : > { %1131 = vbcast.lane.b32.xlu1 %v2478_v61, 360  ;;  %1127 = vbcast.lane.b32.xlu0 %v2478_v61, 352 }
 0x20c   : > { %724 = vst [vmem:[#allocation2 + $0x18] sm:$0xff] %v720_v39  ;;  %723 = vst [vmem:[#allocation2 + $0x58] sm:$0xff] %v719_v40 }
 0x20d   : > { %v740_v41 = vpop.permute.xlu1 %739  ;;  %v736_v42 = vpop.permute.xlu0 %735 }
 0x20e   : > { %v856_v60 = vmul.f32 %v740_v41, %v2489_v5  ;;  %v855_v15 = vmul.f32 %v736_v42, %v2489_v5 }
 0x20f   : > { %1139 = vbcast.lane.b32.xlu1 %v2478_v61, 376  ;;  %1135 = vbcast.lane.b32.xlu0 %v2478_v61, 368 }
 0x211   : > { %v748_v43 = vpop.permute.xlu1 %747  ;;  %v744_v44 = vpop.permute.xlu0 %743 }
 0x212   : > { %v857_v58 = vmul.f32 %v744_v44, %v2494_v9 }
 0x213   : > { %1147 = vbcast.lane.b32.xlu1 %v2487_v2, 360  ;;  %1143 = vbcast.lane.b32.xlu0 %v2487_v2, 352 }
 0x214   : > { %v885_v8 = vmax.f32 %v853_v3, %v857_v58  ;;  %v914_v3 = vld [vmem:[#allocation2 + $0x68] sm:$0xff] }
 0x215   : > { %v756_v45 = vpop.permute.xlu1 %755  ;;  %v752_v46 = vpop.permute.xlu0 %751 }
 0x216   : > { %v860_v59 = vmul.f32 %v756_v45, %v2494_v9  ;;  %v859_v62 = vmul.f32 %v752_v46, %v2494_v9 }
 0x217   : > { %1155 = vbcast.lane.b32.xlu1 %v2487_v2, 376  ;;  %1151 = vbcast.lane.b32.xlu0 %v2487_v2, 368 }
 0x218   : > { %v906_v16 = vmax.f32 %v856_v60, %v860_v59  ;;  %v899_v30 = vmax.f32 %v855_v15, %v859_v62 }
 0x219   : > { %v764_v47 = vpop.permute.xlu1 %763  ;;  %v760_v48 = vpop.permute.xlu0 %759 }
 0x21a   : > { %v861_v4 = vmul.f32 %v760_v48, %v2496_v10 }
 0x21b   : > { %1163 = vbcast.lane.b32.xlu1 %v2503_v14, 360  ;;  %1159 = vbcast.lane.b32.xlu0 %v2503_v14, 352 }
 0x21c   : > { %v886_v26 = vmax.f32 %v885_v8, %v861_v4 }
 0x21d   : > { %v772_v49 = vpop.permute.xlu1 %771  ;;  %v768_v61 = vpop.permute.xlu0 %767 }
 0x21e   : > { %v864_v6 = vmul.f32 %v772_v49, %v2496_v10  ;;  %v863_v17 = vmul.f32 %v768_v61, %v2496_v10 }
 0x21f   : > { %1171 = vbcast.lane.b32.xlu1 %v2503_v14, 376  ;;  %1167 = vbcast.lane.b32.xlu0 %v2503_v14, 368 }
 0x220   : > { %v907_v33 = vmax.f32 %v906_v16, %v864_v6  ;;  %v900_v40 = vmax.f32 %v899_v30, %v863_v17  ;;  %v916_v17 = vld [vmem:[#allocation2 + $0x48] sm:$0xff] }
 0x221   : > { %v780_v50 = vpop.permute.xlu1 %779  ;;  %v776_v51 = vpop.permute.xlu0 %775 }
 0x222   : > { %v866_v11 = vmul.f32 %v780_v50, %v2498_v12  ;;  %v865_v13 = vmul.f32 %v776_v51, %v2498_v12 }
 0x223   : > { %1179 = vbcast.lane.b32.xlu1 %v2513_v19, 360  ;;  %1175 = vbcast.lane.b32.xlu0 %v2513_v19, 352 }
 0x224   : > { %v887_v38 = vmax.f32 %v886_v26, %v865_v13 }
 0x225   : > { %v788_v52 = vpop.permute.xlu1 %787  ;;  %v784_v2 = vpop.permute.xlu0 %783 }
 0x226   : > { %v868_v20 = vmul.f32 %v788_v52, %v2498_v12  ;;  %v867_v36 = vmul.f32 %v784_v2, %v2498_v12 }
 0x227   : > { %1187 = vbcast.lane.b32.xlu1 %v2513_v19, 376  ;;  %1183 = vbcast.lane.b32.xlu0 %v2513_v19, 368  ;;  %v858_v19 = vmul.f32 %v748_v43, %v2494_v9 }
 0x228   : > { %v908_v41 = vmax.f32 %v907_v33, %v868_v20  ;;  %v901_v61 = vmax.f32 %v900_v40, %v867_v36  ;;  %v915_v20 = vld [vmem:[#allocation2 + $0x8] sm:$0xff] }
 0x229   : > { %v796_v57 = vpop.permute.xlu1 %795  ;;  %v792_v55 = vpop.permute.xlu0 %791  ;;  %v892_v7 = vmax.f32 %v854_v1, %v858_v19 }
 0x22a   : > { %v870_v29 = vmul.f32 %v796_v57, %v2508_v18 }
 0x22b   : > { %1195 = vbcast.lane.b32.xlu1 %v2523_v24, 360  ;;  %1191 = vbcast.lane.b32.xlu0 %v2523_v24, 352 }
 0x22d   : > { %v804_v53 = vpop.permute.xlu1 %803  ;;  %v800_v14 = vpop.permute.xlu0 %799 }
 0x22e   : > { %v872_v42 = vmul.f32 %v804_v53, %v2508_v18  ;;  %v871_v43 = vmul.f32 %v800_v14, %v2508_v18 }
 0x22f   : > { %1203 = vbcast.lane.b32.xlu1 %v2523_v24, 376  ;;  %1199 = vbcast.lane.b32.xlu0 %v2523_v24, 368  ;;  %v862_v24 = vmul.f32 %v764_v47, %v2496_v10 }
 0x230   : > { %v909_v57 = vmax.f32 %v908_v41, %v872_v42 }
 0x231   : > { %v812_v56 = vpop.permute.xlu1 %811  ;;  %v808_v54 = vpop.permute.xlu0 %807  ;;  %v893_v25 = vmax.f32 %v892_v7, %v862_v24  ;;  %v913_v24 = vld [vmem:[#allocation2 + $0x50] sm:$0xff] }
 0x232   : > { %v874_v35 = vmul.f32 %v812_v56, %v2518_v23  ;;  %v873_v39 = vmul.f32 %v808_v54, %v2518_v23 }
 0x233   : > { %1211 = vbcast.lane.b32.xlu1 %v2533_v28, 360  ;;  %1207 = vbcast.lane.b32.xlu0 %v2533_v28, 352  ;;  %v894_v37 = vmax.f32 %v893_v25, %v866_v11 }
 0x235   : > { %v820_v63 = vpop.permute.xlu1 %819  ;;  %v816_v0 = vpop.permute.xlu0 %815  ;;  %v895_v46 = vmax.f32 %v894_v37, %v870_v29 }
 0x236   : > { %v876_v50 = vmul.f32 %v820_v63, %v2518_v23  ;;  %v875_v51 = vmul.f32 %v816_v0, %v2518_v23 }
 0x237   : > { %1219 = vbcast.lane.b32.xlu1 %v2533_v28, 376  ;;  %1215 = vbcast.lane.b32.xlu0 %v2533_v28, 368  ;;  %v869_v28 = vmul.f32 %v792_v55, %v2508_v18  ;;  %v896_v52 = vmax.f32 %v895_v46, %v874_v35  ;;  %v902_v55 = vmax.f32 %v901_v61, %v871_v43 }
 0x238   : > { %v910_v0 = vmax.f32 %v909_v57, %v876_v50 }
 0x239   : > { %v828_v21 = vpop.permute.xlu1 %827  ;;  %v824_v22 = vpop.permute.xlu0 %823  ;;  %v888_v47 = vmax.f32 %v887_v38, %v869_v28  ;;  %v903_v1 = vmax.f32 %v902_v55, %v875_v51 }
 0x23a   : > { %v878_v48 = vmul.f32 %v828_v21, %v2528_v27  ;;  %v877_v49 = vmul.f32 %v824_v22, %v2528_v27 }
 0x23b   : > { %1035 = vbcast.lane.b32.xlu1 %v2543_v32, 344  ;;  %1031 = vbcast.lane.b32.xlu0 %v2543_v32, 336  ;;  %v889_v2 = vmax.f32 %v888_v47, %v873_v39 }
 0x23c   : > { %v897_v19 = vmax.f32 %v896_v52, %v878_v48 }
 0x23d   : > { %v836_v44 = vpop.permute.xlu1 %835  ;;  %v832_v45 = vpop.permute.xlu0 %831  ;;  %v890_v58 = vmax.f32 %v889_v2, %v877_v49 }
 0x23e   : > { %v880_v53 = vmul.f32 %v836_v44, %v2528_v27  ;;  %v879_v14 = vmul.f32 %v832_v45, %v2528_v27 }
 0x23f   : > { %1227 = vbcast.lane.b32.xlu1 %v2543_v32, 360  ;;  %1223 = vbcast.lane.b32.xlu0 %v2543_v32, 352 }
 0x240   : > { %v911_v62 = vmax.f32 %v910_v0, %v880_v53  ;;  %v904_v6 = vmax.f32 %v903_v1, %v879_v14 }
 0x241   : > { %v844_v56 = vpop.permute.xlu1 %843  ;;  %v840_v54 = vpop.permute.xlu0 %839 }
 0x242   : > { %v882_v59 = vmul.f32 %v844_v56, %v2538_v31  ;;  %v881_v63 = vmul.f32 %v840_v54, %v2538_v31 }
 0x243   : > { %1235 = vbcast.lane.b32.xlu1 %v2543_v32, 376  ;;  %1231 = vbcast.lane.b32.xlu0 %v2543_v32, 368 }
 0x244   : > { %v898_v4 = vmax.f32 %v897_v19, %v882_v59  ;;  %v891_v60 = vmax.f32 %v890_v58, %v881_v63 }
 0x245   : > { %v852_v7 = vpop.permute.xlu1 %851  ;;  %v848_v8 = vpop.permute.xlu0 %847 }
 0x246   : > { %v918_v11 = vmax.f32 %v914_v3, %v898_v4  ;;  %v917_v13 = vmax.f32 %v913_v24, %v891_v60  ;;  %v884_v15 = vmul.f32 %v852_v7, %v2538_v31  ;;  %v883_v16 = vmul.f32 %v848_v8, %v2538_v31 }
 0x247   : > { %1043 = vbcast.lane.b32.xlu1 %v2551_v34, 328  ;;  %1039 = vbcast.lane.b32.xlu0 %v2551_v34, 320 }
 0x248   : > { %922 = vst [vmem:[#allocation2 + $0x68] sm:$0xff] %v918_v11  ;;  %921 = vst [vmem:[#allocation2 + $0x50] sm:$0xff] %v917_v13  ;;  %v912_v32 = vmax.f32 %v911_v62, %v884_v15  ;;  %v905_v21 = vmax.f32 %v904_v6, %v883_v16 }
 0x249   : > { %v932_v22 = vpop.permute.xlu1 %931  ;;  %v928_v25 = vpop.permute.xlu0 %927 }
 0x24a   : > { %v920_v26 = vmax.f32 %v916_v17, %v912_v32  ;;  %v919_v29 = vmax.f32 %v915_v20, %v905_v21  ;;  %v1054_v37 = vmul.f32 %v932_v22, %v2489_v5  ;;  %v1053_v38 = vmul.f32 %v928_v25, %v2489_v5 }
 0x24b   : > { %1051 = vbcast.lane.b32.xlu1 %v2551_v34, 344  ;;  %1047 = vbcast.lane.b32.xlu0 %v2551_v34, 336 }
 0x24c   : > { %924 = vst [vmem:[#allocation2 + $0x48] sm:$0xff] %v920_v26  ;;  %923 = vst [vmem:[#allocation2 + $0x8] sm:$0xff] %v919_v29 }
 0x24d   : > { %v940_v28 = vpop.permute.xlu1 %939  ;;  %v936_v30 = vpop.permute.xlu0 %935 }
 0x24e   : > { %v1056_v44 = vmul.f32 %v940_v28, %v2489_v5  ;;  %v1055_v45 = vmul.f32 %v936_v30, %v2489_v5 }
 0x24f   : > { %1243 = vbcast.lane.b32.xlu1 %v2551_v34, 360  ;;  %1239 = vbcast.lane.b32.xlu0 %v2551_v34, 352 }
 0x251   : > { %v948_v33 = vpop.permute.xlu1 %947  ;;  %v944_v36 = vpop.permute.xlu0 %943 }
 0x252   : > { %v1058_v35 = vmul.f32 %v948_v33, %v2494_v9  ;;  %v1057_v39 = vmul.f32 %v944_v36, %v2494_v9 }
 0x253   : > { %1251 = vbcast.lane.b32.xlu1 %v2551_v34, 376  ;;  %1247 = vbcast.lane.b32.xlu0 %v2551_v34, 368 }
 0x254   : > { %v1092_v40 = vmax.f32 %v1054_v37, %v1058_v35  ;;  %v1085_v41 = vmax.f32 %v1053_v38, %v1057_v39 }
 0x255   : > { %v956_v42 = vpop.permute.xlu1 %955  ;;  %v952_v43 = vpop.permute.xlu0 %951 }
 0x256   : > { %v1060_v46 = vmul.f32 %v956_v42, %v2494_v9  ;;  %v1059_v47 = vmul.f32 %v952_v43, %v2494_v9 }
 0x258   : > { %v1106_v48 = vmax.f32 %v1056_v44, %v1060_v46  ;;  %v1099_v49 = vmax.f32 %v1055_v45, %v1059_v47 }
 0x259   : > { %v964_v61 = vpop.permute.xlu1 %963  ;;  %v960_v50 = vpop.permute.xlu0 %959 }
 0x25a   : > { %v1062_v51 = vmul.f32 %v964_v61, %v2496_v10  ;;  %v1061_v34 = vmul.f32 %v960_v50, %v2496_v10 }
 0x25c   : > { %v1093_v52 = vmax.f32 %v1092_v40, %v1062_v51  ;;  %v1086_v2 = vmax.f32 %v1085_v41, %v1061_v34 }
 0x25d   : > { %v972_v57 = vpop.permute.xlu1 %971  ;;  %v968_v55 = vpop.permute.xlu0 %967 }
 0x25e   : > { %v1064_v53 = vmul.f32 %v972_v57, %v2496_v10  ;;  %v1063_v14 = vmul.f32 %v968_v55, %v2496_v10 }
 0x260   : > { %v1107_v56 = vmax.f32 %v1106_v48, %v1064_v53  ;;  %v1100_v54 = vmax.f32 %v1099_v49, %v1063_v14 }
 0x261   : > { %v980_v19 = vpop.permute.xlu1 %979  ;;  %v976_v58 = vpop.permute.xlu0 %975 }
 0x262   : > { %v1066_v59 = vmul.f32 %v980_v19, %v2498_v12  ;;  %v1065_v63 = vmul.f32 %v976_v58, %v2498_v12 }
 0x264   : > { %v1094_v0 = vmax.f32 %v1093_v52, %v1066_v59  ;;  %v1087_v1 = vmax.f32 %v1086_v2, %v1065_v63 }
 0x265   : > { %v988_v3 = vpop.permute.xlu1 %987  ;;  %v984_v24 = vpop.permute.xlu0 %983 }
 0x266   : > { %v1068_v4 = vmul.f32 %v988_v3, %v2498_v12  ;;  %v1067_v60 = vmul.f32 %v984_v24, %v2498_v12 }
 0x268   : > { %v1108_v62 = vmax.f32 %v1107_v56, %v1068_v4  ;;  %v1101_v6 = vmax.f32 %v1100_v54, %v1067_v60 }
 0x269   : > { %v996_v7 = vpop.permute.xlu1 %995  ;;  %v992_v8 = vpop.permute.xlu0 %991 }
 0x26a   : > { %v1070_v11 = vmul.f32 %v996_v7, %v2508_v18  ;;  %v1069_v13 = vmul.f32 %v992_v8, %v2508_v18 }
 0x26c   : > { %v2735_v15 = vmax.f32 %v1094_v0, %v1070_v11  ;;  %v2737_v16 = vmax.f32 %v1087_v1, %v1069_v13 }
 0x26d   : > { %v1004_v17 = vpop.permute.xlu1 %1003  ;;  %v1000_v20 = vpop.permute.xlu0 %999 }
 0x26e   : > { %v1072_v32 = vmul.f32 %v1004_v17, %v2508_v18  ;;  %v1071_v21 = vmul.f32 %v1000_v20, %v2508_v18 }
 0x270   : > { %v2741_v22 = vmax.f32 %v1108_v62, %v1072_v32  ;;  %v2743_v25 = vmax.f32 %v1101_v6, %v1071_v21 }
 0x271   : > { %v1012_v26 = vpop.permute.xlu1 %1011  ;;  %v1008_v29 = vpop.permute.xlu0 %1007 }
 0x272   : > { %v2746_v28 = vmul.f32 %v1012_v26, %v2518_v23  ;;  %v2749_v30 = vmul.f32 %v1008_v29, %v2518_v23 }
 0x274   : > { %v1096_v33 = vmax.f32 %v2735_v15, %v2746_v28  ;;  %v1089_v36 = vmax.f32 %v2737_v16, %v2749_v30 }
 0x275   : > { %v1020_v37 = vpop.permute.xlu1 %1019  ;;  %v1016_v38 = vpop.permute.xlu0 %1015 }
 0x276   : > { %v2756_v35 = vmul.f32 %v1020_v37, %v2518_v23  ;;  %v2759_v39 = vmul.f32 %v1016_v38, %v2518_v23 }
 0x278   : > { %v1110_v40 = vmax.f32 %v2741_v22, %v2756_v35  ;;  %v1103_v41 = vmax.f32 %v2743_v25, %v2759_v39  ;;  %v1116_v35 = vld [vmem:[#allocation2 + $0x38] sm:$0xff]  ;;  %v1115_v39 = vld [vmem:[#allocation2 + $0x10] sm:$0xff] }
 0x279   : > { %v1028_v42 = vpop.permute.xlu1 %1027  ;;  %v1024_v43 = vpop.permute.xlu0 %1023 }
 0x27a   : > { %v1078_v7 = vmul.f32 %v1028_v42, %v2528_v27  ;;  %v1077_v8 = vmul.f32 %v1024_v43, %v2528_v27 }
 0x27d   : > { %v1132_v44 = vpop.permute.xlu1 %1131  ;;  %v1128_v45 = vpop.permute.xlu0 %1127 }
 0x27e   : > { %v1254_v17 = vmul.f32 %v1132_v44, %v2489_v5  ;;  %v1253_v20 = vmul.f32 %v1128_v45, %v2489_v5 }
 0x281   : > { %v1140_v46 = vpop.permute.xlu1 %1139  ;;  %v1136_v47 = vpop.permute.xlu0 %1135 }
 0x282   : > { %v1256_v26 = vmul.f32 %v1140_v46, %v2489_v5  ;;  %v1255_v29 = vmul.f32 %v1136_v47, %v2489_v5 }
 0x285   : > { %v1148_v48 = vpop.permute.xlu1 %1147  ;;  %v1144_v49 = vpop.permute.xlu0 %1143 }
 0x286   : > { %v1258_v4 = vmul.f32 %v1148_v48, %v2494_v9  ;;  %v1257_v60 = vmul.f32 %v1144_v49, %v2494_v9 }
 0x288   : > { %v1292_v42 = vmax.f32 %v1254_v17, %v1258_v4  ;;  %v1285_v43 = vmax.f32 %v1253_v20, %v1257_v60 }
 0x289   : > { %v1156_v61 = vpop.permute.xlu1 %1155  ;;  %v1152_v50 = vpop.permute.xlu0 %1151 }
 0x28a   : > { %v1260_v11 = vmul.f32 %v1156_v61, %v2494_v9  ;;  %v1259_v13 = vmul.f32 %v1152_v50, %v2494_v9 }
 0x28c   : > { %v1306_v49 = vmax.f32 %v1256_v26, %v1260_v11  ;;  %v1299_v61 = vmax.f32 %v1255_v29, %v1259_v13 }
 0x28d   : > { %v1164_v51 = vpop.permute.xlu1 %1163  ;;  %v1160_v34 = vpop.permute.xlu0 %1159 }
 0x28e   : > { %v1262_v32 = vmul.f32 %v1164_v51, %v2496_v10  ;;  %v1261_v21 = vmul.f32 %v1160_v34, %v2496_v10  ;;  %v1097_v34 = vmax.f32 %v1096_v33, %v1078_v7  ;;  %v1113_v7 = vld [vmem:[#allocation2 + $0x40] sm:$0xff] }
 0x290   : > { %v1293_v51 = vmax.f32 %v1292_v42, %v1262_v32  ;;  %v1286_v5 = vmax.f32 %v1285_v43, %v1261_v21 }
 0x291   : > { %v1172_v52 = vpop.permute.xlu1 %1171  ;;  %v1168_v2 = vpop.permute.xlu0 %1167 }
 0x292   : > { %v1264_v37 = vmul.f32 %v1172_v52, %v2496_v10  ;;  %v1263_v38 = vmul.f32 %v1168_v2, %v2496_v10  ;;  %v1090_v52 = vmax.f32 %v1089_v36, %v1077_v8  ;;  %v1114_v36 = vld [vmem:[#allocation2 + $0x20] sm:$0xff] }
 0x294   : > { %v1307_v2 = vmax.f32 %v1306_v49, %v1264_v37 }
 0x295   : > { %v1180_v57 = vpop.permute.xlu1 %1179  ;;  %v1176_v55 = vpop.permute.xlu0 %1175 }
 0x296   : > { %v1266_v9 = vmul.f32 %v1180_v57, %v2498_v12  ;;  %v1265_v44 = vmul.f32 %v1176_v55, %v2498_v12  ;;  %v1300_v57 = vmax.f32 %v1299_v61, %v1263_v38 }
 0x298   : > { %v1294_v55 = vmax.f32 %v1293_v51, %v1266_v9  ;;  %v1314_v51 = vld [vmem:[#allocation2 + $0x70] sm:$0xff] }
 0x299   : > { %v1188_v53 = vpop.permute.xlu1 %1187  ;;  %v1184_v14 = vpop.permute.xlu0 %1183 }
 0x29a   : > { %v1268_v50 = vmul.f32 %v1188_v53, %v2498_v12  ;;  %v1267_v46 = vmul.f32 %v1184_v14, %v2498_v12  ;;  %v1287_v53 = vmax.f32 %v1286_v5, %v1265_v44  ;;  %v1313_v5 = vld [vmem:[#allocation2 + $0x60] sm:$0xff] }
 0x29c   : > { %v1308_v60 = vmax.f32 %v1307_v2, %v1268_v50 }
 0x29d   : > { %v1196_v56 = vpop.permute.xlu1 %1195  ;;  %v1192_v54 = vpop.permute.xlu0 %1191 }
 0x29e   : > { %v1270_v47 = vmul.f32 %v1196_v56, %v2508_v18  ;;  %v1269_v10 = vmul.f32 %v1192_v54, %v2508_v18  ;;  %v1301_v54 = vmax.f32 %v1300_v57, %v1267_v46 }
 0x2a0   : > { %v1295_v28 = vmax.f32 %v1294_v55, %v1270_v47  ;;  %v1288_v33 = vmax.f32 %v1287_v53, %v1269_v10  ;;  %v1316_v53 = vld [vmem:[#allocation2 + $0x28] sm:$0xff] }
 0x2a1   : > { %v1204_v19 = vpop.permute.xlu1 %1203  ;;  %v1200_v58 = vpop.permute.xlu0 %1199 }
 0x2a5   : > { %v1212_v59 = vpop.permute.xlu1 %1211  ;;  %v1208_v63 = vpop.permute.xlu0 %1207 }
 0x2a6   : > { %v1274_v16 = vmul.f32 %v1212_v59, %v2518_v23  ;;  %v1273_v30 = vmul.f32 %v1208_v63, %v2518_v23 }
 0x2a8   : > { %v1296_v29 = vmax.f32 %v1295_v28, %v1274_v16  ;;  %v1289_v37 = vmax.f32 %v1288_v33, %v1273_v30  ;;  %v1389_v28 = vld [vmem:[#allocation14 + $0x68] sm:$0xff] (%p402_p2)  ;;  %v1388_v16 = vld [vmem:[#allocation14 + $0x60] sm:$0xff] (%p402_p2) }
 0x2a9   : > { %v2765_v0 = vpop.permute.xlu1 %1219  ;;  %v2767_v1 = vpop.permute.xlu0 %1215  ;;  %v2832_v33 = vld [vmem:[#allocation13 + $0x68] sm:$0xff] (%p402_p2)  ;;  %v2836_v30 = vld [vmem:[#allocation13 + $0x60] sm:$0xff] (%p402_p2) }
 0x2aa   : > { %v1276_v22 = vmul.f32 %v2765_v0, %v2518_v23  ;;  %v1275_v25 = vmul.f32 %v2767_v1, %v2518_v23 }
 0x2ad   : > { %v1036_v3 = vpop.permute.xlu1 %1035  ;;  %v1032_v24 = vpop.permute.xlu0 %1031 }
 0x2ae   : > { %v1080_v12 = vmul.f32 %v1036_v3, %v2528_v27  ;;  %v1079_v14 = vmul.f32 %v1032_v24, %v2528_v27  ;;  %v1272_v3 = vmul.f32 %v1204_v19, %v2508_v18  ;;  %v1271_v24 = vmul.f32 %v1200_v58, %v2508_v18 }
 0x2b0   : > { %v1111_v17 = vmax.f32 %v1110_v40, %v1080_v12  ;;  %v1104_v20 = vmax.f32 %v1103_v41, %v1079_v14  ;;  %v1309_v40 = vmax.f32 %v1308_v60, %v1272_v3  ;;  %v1302_v41 = vmax.f32 %v1301_v54, %v1271_v24  ;;  %v1315_v12 = vld [vmem:[#allocation2 + $0x78] sm:$0xff]  ;;  %v1386_v3 = vld [vmem:[#allocation14 + $0x50] sm:$0xff] (%p402_p2) }
 0x2b1   : > { %v1228_v62 = vpop.permute.xlu1 %1227  ;;  %v1224_v6 = vpop.permute.xlu0 %1223  ;;  %v1391_v54 = vld [vmem:[#allocation14 + $0x78] sm:$0xff] (%p402_p2)  ;;  %v2844_v24 = vld [vmem:[#allocation13 + $0x50] sm:$0xff] (%p402_p2) }
 0x2b2   : > { %v1278_v59 = vmul.f32 %v1228_v62, %v2528_v27  ;;  %v1277_v63 = vmul.f32 %v1224_v6, %v2528_v27  ;;  %v1310_v50 = vmax.f32 %v1309_v40, %v1276_v22  ;;  %v1303_v46 = vmax.f32 %v1302_v41, %v1275_v25  ;;  %2017 = vmatprep.subr.mxu1 (%p402_p2), %v1391_v54  ;;  %v1378_v22 = vld [vmem:[#allocation14 + $0x10] sm:$0xff] (%p402_p2)  ;;  %v1376_v40 = vld [vmem:[#allocation14] sm:$0xff] (%p402_p2) }
 0x2b3   :  { %2018 = vmatpush3.msra.mxu1 (%p402_p2), %v1391_v54  ;;  %v2876_v25 = vld [vmem:[#allocation13 + $0x10] sm:$0xff] (%p402_p2)  ;;  %v2884_v41 = vld [vmem:[#allocation13] sm:$0xff] (%p402_p2) }
 0x2b4   : > { %v1297_v38 = vmax.f32 %v1296_v29, %v1278_v59  ;;  %v1290_v42 = vmax.f32 %v1289_v37, %v1277_v63  ;;  %v1383_v59 = vld [vmem:[#allocation14 + $0x38] sm:$0xff] (%p402_p2) }
 0x2b5   : > { %v1236_v48 = vpop.permute.xlu1 %1235  ;;  %v1232_v45 = vpop.permute.xlu0 %1231  ;;  %v2856_v63 = vld [vmem:[#allocation13 + $0x38] sm:$0xff] (%p402_p2) }
 0x2b6   : > { %v1280_v43 = vmul.f32 %v1236_v48, %v2528_v27  ;;  %v1279_v9 = vmul.f32 %v1232_v45, %v2528_v27  ;;  %v1379_v29 = vld [vmem:[#allocation14 + $0x18] sm:$0xff] (%p402_p2) }
 0x2b7   :  { %v2872_v37 = vld [vmem:[#allocation13 + $0x18] sm:$0xff] (%p402_p2) }
 0x2b8   : > { %v1304_v48 = vmax.f32 %v1303_v46, %v1279_v9  ;;  %v1346_v9 = vld [vmem:[#allocation5 + $0x10] sm:$0xff] (%p402_p2) }
 0x2b9   : > { %v1044_v4 = vpop.permute.xlu1 %1043  ;;  %v1040_v56 = vpop.permute.xlu0 %1039  ;;  %v1350_v46 = vld [vmem:[#allocation5 + $0x30] sm:$0xff] (%p402_p2) }
 0x2ba   : > { %v1082_v11 = vmul.f32 %v1044_v4, %v2538_v31  ;;  %v1081_v15 = vmul.f32 %v1040_v56, %v2538_v31 }
 0x2bc   : > { %v1098_v8 = vmax.f32 %v1097_v34, %v1082_v11  ;;  %v1091_v13 = vmax.f32 %v1090_v52, %v1081_v15  ;;  %v1311_v34 = vmax.f32 %v1310_v50, %v1280_v43  ;;  %v2826_v11 = vld [vmem:[#allocation13 + $0x78] sm:$0xff] (%p402_p2)  ;;  %v2829_v15 = vld [vmem:[#allocation13 + $0x70] sm:$0xff] (%p402_p2)  ;;  %v1334_v50 = vld [vmem:[#allocation2 + $0x8] sm:$0xff] (%p402_p2) }
 0x2bd   : > { %v1052_v32 = vpop.permute.xlu1 %1051  ;;  %v1048_v21 = vpop.permute.xlu0 %1047  ;;  %2073 = vmatprep.subr.mxu0 (%p402_p2), %v2826_v11  ;;  %v1330_v43 = vld [vmem:[#allocation2 + $0x58] sm:$0xff] (%p402_p2) }
 0x2be   : > { %v1118_v26 = vmax.f32 %v1114_v36, %v1098_v8  ;;  %v1117_v19 = vmax.f32 %v1113_v7, %v1091_v13  ;;  %v1084_v18 = vmul.f32 %v1052_v32, %v2538_v31  ;;  %v1083_v58 = vmul.f32 %v1048_v21, %v2538_v31  ;;  %2074 = vmatpush3.msra.mxu0 (%p402_p2), %v2826_v11  ;;  %v1387_v36 = vld [vmem:[#allocation14 + $0x58] sm:$0xff] (%p402_p2)  ;;  %v1385_v8 = vld [vmem:[#allocation14 + $0x48] sm:$0xff] (%p402_p2)  ;;  %v1382_v32 = vld [vmem:[#allocation14 + $0x30] sm:$0xff] (%p402_p2) }
 0x2bf   :  { %2075 = vmatprep.subr.mxu0 (%p402_p2), %v2829_v15  ;;  %v2840_v7 = vld [vmem:[#allocation13 + $0x58] sm:$0xff] (%p402_p2)  ;;  %v2848_v13 = vld [vmem:[#allocation13 + $0x48] sm:$0xff] (%p402_p2)  ;;  %v2860_v21 = vld [vmem:[#allocation13 + $0x30] sm:$0xff] (%p402_p2) }
 0x2c0   : > { %1122 = vst [vmem:[#allocation2 + $0x20] sm:$0xff] %v1118_v26  ;;  %1121 = vst [vmem:[#allocation2 + $0x40] sm:$0xff] %v1117_v19  ;;  %v1112_v62 = vmax.f32 %v1111_v17, %v1084_v18  ;;  %v1105_v6 = vmax.f32 %v1104_v20, %v1083_v58  ;;  %2076 = vmatpush3.msra.mxu0 (%p402_p2), %v2829_v15  ;;  %v1384_v17 = vld [vmem:[#allocation14 + $0x40] sm:$0xff] (%p402_p2)  ;;  %v1381_v26 = vld [vmem:[#allocation14 + $0x28] sm:$0xff] (%p402_p2) }
 0x2c1   : > { %v1244_v44 = vpop.permute.xlu1 %1243  ;;  %v1240_v49 = vpop.permute.xlu0 %1239  ;;  %2077 = vmatprep.subr.mxu0 (%p402_p2), %v2832_v33  ;;  %v2852_v20 = vld [vmem:[#allocation13 + $0x40] sm:$0xff] (%p402_p2)  ;;  %v2864_v19 = vld [vmem:[#allocation13 + $0x28] sm:$0xff] (%p402_p2) }
 0x2c2   : > { %v1120_v0 = vmax.f32 %v1116_v35, %v1112_v62  ;;  %v1119_v61 = vmax.f32 %v1115_v39, %v1105_v6  ;;  %v1282_v23 = vmul.f32 %v1244_v44, %v2538_v31  ;;  %v1281_v1 = vmul.f32 %v1240_v49, %v2538_v31  ;;  %2078 = vmatpush3.msra.mxu0 (%p402_p2), %v2832_v33  ;;  %v1380_v18 = vld [vmem:[#allocation14 + $0x20] sm:$0xff] (%p402_p2)  ;;  %v1377_v35 = vld [vmem:[#allocation14 + $0x8] sm:$0xff] (%p402_p2)  ;;  %v1328_v62 = vld [vmem:[#allocation2 + $0x30] sm:$0xff] (%p402_p2) }
 0x2c3   :  { %2079 = vmatprep.subr.mxu0 (%p402_p2), %v2836_v30  ;;  %v2868_v58 = vld [vmem:[#allocation13 + $0x20] sm:$0xff] (%p402_p2)  ;;  %v2880_v39 = vld [vmem:[#allocation13 + $0x8] sm:$0xff] (%p402_p2)  ;;  %2049 = vmatprep.mubr.f32.mxu1 (%p402_p2), %v1328_v62  ;;  %v1331_v44 = vld [vmem:[#allocation2 + $0x18] sm:$0xff] (%p402_p2) }
 0x2c4   : > { %1124 = vst [vmem:[#allocation2 + $0x38] sm:$0xff] %v1120_v0  ;;  %1123 = vst [vmem:[#allocation2 + $0x10] sm:$0xff] %v1119_v61  ;;  %v1298_v47 = vmax.f32 %v1297_v38, %v1282_v23  ;;  %v1291_v10 = vmax.f32 %v1290_v42, %v1281_v1  ;;  %2080 = vmatpush3.msra.mxu0 (%p402_p2), %v2836_v30  ;;  %v1344_v6 = vld [vmem:[#allocation5] sm:$0xff] (%p402_p2)  ;;  %v1345_v42 = vld [vmem:[#allocation5 + $0x8] sm:$0xff] (%p402_p2) }
 0x2c5   : > { %v1252_v52 = vpop.permute.xlu1 %1251  ;;  %v1248_v27 = vpop.permute.xlu0 %1247  ;;  %2081 = vmatprep.subr.mxu0 (%p402_p2), %v2840_v7  ;;  %v1329_v38 = vld [vmem:[#allocation2] sm:$0xff] (%p402_p2)  ;;  %2105 = vmatprep.mubr.f32.mxu0 (%p402_p2), %v1344_v6  ;;  %v1347_v49 = vld [vmem:[#allocation5 + $0x18] sm:$0xff] (%p402_p2)  ;;  %v1332_v0 = vld [vmem:[#allocation2 + $0x50] sm:$0xff] (%p402_p2) }
 0x2c6   : > { %v1318_v45 = vmax.f32 %v1314_v51, %v1298_v47  ;;  %v1317_v2 = vmax.f32 %v1313_v5, %v1291_v10  ;;  %v1284_v57 = vmul.f32 %v1252_v52, %v2538_v31  ;;  %v1283_v55 = vmul.f32 %v1248_v27, %v2538_v31  ;;  %v1390_v31 = vld [vmem:[#allocation14 + $0x70] sm:$0xff] (%p402_p2)  ;;  %2082 = vmatpush3.msra.mxu0 (%p402_p2), %v2840_v7  ;;  %v1348_v61 = vld [vmem:[#allocation5 + $0x20] sm:$0xff] (%p402_p2)  ;;  %v1333_v23 = vld [vmem:[#allocation2 + $0x68] sm:$0xff] (%p402_p2) }
 0x2c7   :  { %2019 = vmatprep.subr.mxu1 (%p402_p2), %v1390_v31  ;;  %2083 = vmatprep.subr.mxu0 (%p402_p2), %v2844_v24  ;;  %v1349_v1 = vld [vmem:[#allocation5 + $0x28] sm:$0xff] (%p402_p2)  ;;  %v1351_v5 = vld [vmem:[#allocation5 + $0x38] sm:$0xff] (%p402_p2)  ;;  %v1336_v47 = vld [vmem:[#allocation2 + $0x40] sm:$0xff] (%p402_p2) }
 0x2c8   : > { %1322 = vst [vmem:[#allocation2 + $0x70] sm:$0xff] %v1318_v45  ;;  %1321 = vst [vmem:[#allocation2 + $0x60] sm:$0xff] %v1317_v2  ;;  %v1312_v14 = vmax.f32 %v1311_v34, %v1284_v57  ;;  %v1305_v4 = vmax.f32 %v1304_v48, %v1283_v55  ;;  %404 = sbr.rel (!%p402_p2) target bundleno = 335 (0x14f), region = 93  ;;  %2020 = vmatpush3.msra.mxu1 (%p402_p2), %v1390_v31  ;;  %2084 = vmatpush3.msra.mxu0 (%p402_p2), %v2844_v24  ;;  %v1335_v51 = vld [vmem:[#allocation2 + $0x48] sm:$0xff] (%p402_p2)  ;;  %v1337_v10 = vld [vmem:[#allocation2 + $0x20] sm:$0xff] (%p402_p2) }
 0x2c9   :  { %2021 = vmatprep.subr.mxu1 (%p402_p2), %v1389_v28  ;;  %2085 = vmatprep.subr.mxu0 (%p402_p2), %v2848_v13  ;;  %v1352_v57 = vld [vmem:[#allocation5 + $0x40] sm:$0xff] (%p402_p2)  ;;  %v1353_v55 = vld [vmem:[#allocation5 + $0x48] sm:$0xff] (%p402_p2) }
 0x2ca   : > { %v1320_v56 = vmax.f32 %v1316_v53, %v1312_v14  ;;  %v1319_v60 = vmax.f32 %v1315_v12, %v1305_v4  ;;  %2022 = vmatpush3.msra.mxu1 (%p402_p2), %v1389_v28  ;;  %2086 = vmatpush3.msra.mxu0 (%p402_p2), %v2848_v13  ;;  %v1354_v53 = vld [vmem:[#allocation5 + $0x50] sm:$0xff] (%p402_p2)  ;;  %v1355_v12 = vld [vmem:[#allocation5 + $0x58] sm:$0xff] (%p402_p2)  ;;  %v1356_v14 = vld [vmem:[#allocation5 + $0x60] sm:$0xff] (%p402_p2) }
 0x2cb   :  { %2023 = vmatprep.subr.mxu1 (%p402_p2), %v1388_v16  ;;  %2087 = vmatprep.subr.mxu0 (%p402_p2), %v2852_v20  ;;  %v1338_v34 = vld [vmem:[#allocation2 + $0x10] sm:$0xff] (%p402_p2)  ;;  %v1339_v48 = vld [vmem:[#allocation2 + $0x38] sm:$0xff] (%p402_p2)  ;;  %v1357_v4 = vld [vmem:[#allocation5 + $0x68] sm:$0xff] (%p402_p2) }
 0x2cc   : > { %1324 = vst [vmem:[#allocation2 + $0x28] sm:$0xff] %v1320_v56  ;;  %1323 = vst [vmem:[#allocation2 + $0x78] sm:$0xff] %v1319_v60  ;;  %2024 = vmatpush3.msra.mxu1 (%p402_p2), %v1388_v16  ;;  %2088 = vmatpush3.msra.mxu0 (%p402_p2), %v2852_v20  ;;  %v1358_v56 = vld [vmem:[#allocation5 + $0x70] sm:$0xff] (%p402_p2)  ;;  %v1359_v60 = vld [vmem:[#allocation5 + $0x78] sm:$0xff] (%p402_p2) }
 0x2cd   :  { %2025 = vmatprep.subr.mxu1 %v1387_v36  ;;  %2089 = vmatprep.subr.mxu0 %v2856_v63  ;;  %v2925_v31 = vld [vmem:[%s2971_s7] ss:$0 sm:$0xff]  ;;  %s2381_s7 = smov [#allocation16]  }
 0x2ce   :  { %2026 = vmatpush3.msra.mxu1 %v1387_v36  ;;  %2090 = vmatpush3.msra.mxu0 %v2856_v63  ;;  %s1822_s18 = sshll.u32 %s2381_s7, 4  ;;  %s1823_s18 = int_to_ptr.vmem [resolvable:$true] %s1822_s18 }
 0x2cf   :  { %2027 = vmatprep.subr.mxu1 %v1386_v3  ;;  %2091 = vmatprep.subr.mxu0 %v2860_v21  ;;  %v1340_v52 = vld [vmem:[#allocation2 + $0x60] sm:$0xff]  ;;  %v1341_v27 = vld [vmem:[#allocation2 + $0x70] sm:$0xff]  ;;  %s2333_s19 = scalar_lea.vmem %s1823_s18, 2048  ;;  %p2338_p4 = scmp.lt.s32.totalorder %s1823_s18, %s1823_s18 }
 0x2d0   :  { %2028 = vmatpush3.msra.mxu1 %v1386_v3  ;;  %2092 = vmatpush3.msra.mxu0 %v2860_v21  ;;  %p2334_p3 = scmp.ne.s32.totalorder %s1823_s18, %s2333_s19  ;;  %p2339_p5 = scmp.lt.s32.totalorder %s2333_s19, %s2333_s19 }
 0x2d1   :  { %2029 = vmatprep.subr.mxu1 %v1385_v8  ;;  %2093 = vmatprep.subr.mxu0 %v2864_v19 }
 0x2d2   :  { %2030 = vmatpush3.msra.mxu1 %v1385_v8  ;;  %2094 = vmatpush3.msra.mxu0 %v2864_v19  ;;  %p2340_p6 = por %p2339_p5, %p2338_p4 }
 0x2d3   :  { %2031 = vmatprep.subr.mxu1 %v1384_v17  ;;  %2095 = vmatprep.subr.mxu0 %v2868_v58  ;;  %v1342_v45 = vld [vmem:[#allocation2 + $0x78] sm:$0xff]  ;;  %v1343_v2 = vld [vmem:[#allocation2 + $0x28] sm:$0xff] }
 0x2d4   :  { %2032 = vmatpush3.msra.mxu1 %v1384_v17  ;;  %2096 = vmatpush3.msra.mxu0 %v2868_v58  ;;  %p2341_p7 = pnand %p2340_p6, %p2334_p3 }
 0x2d5   :  { %2033 = vmatprep.subr.mxu1 %v1383_v59  ;;  %2097 = vmatprep.subr.mxu0 %v2872_v37 }
 0x2d6   :  { %2034 = vmatpush3.msra.mxu1 %v1383_v59  ;;  %2098 = vmatpush3.msra.mxu0 %v2872_v37 }
 0x2d7   :  { %2035 = vmatprep.subr.mxu1 %v1382_v32  ;;  %2099 = vmatprep.subr.mxu0 %v2876_v25 }
 0x2d8   :  { %2036 = vmatpush3.msra.mxu1 %v1382_v32  ;;  %2100 = vmatpush3.msra.mxu0 %v2876_v25 }
 0x2d9   :  { %2037 = vmatprep.subr.mxu1 %v1381_v26  ;;  %2101 = vmatprep.subr.mxu0 %v2880_v39 }
 0x2da   :  { %2038 = vmatpush3.msra.mxu1 %v1381_v26  ;;  %2102 = vmatpush3.msra.mxu0 %v2880_v39 }
 0x2db   :  { %2039 = vmatprep.subr.mxu1 %v1380_v18  ;;  %2103 = vmatprep.subr.mxu0 %v2884_v41 }
 0x2dc   :  { %2040 = vmatpush3.msra.mxu1 %v1380_v18  ;;  %2104 = vmatpush3.msra.mxu0 %v2884_v41 }
 0x2dd   :  { %2041 = vmatprep.subr.mxu1 %v1379_v29  ;;  %2106 = vmatmul.mubr.f32.vlgmr.msra.gmra.mxu0 %v1345_v42 }
 0x2de   :  { %2042 = vmatpush3.msra.mxu1 %v1379_v29  ;;  %2108 = vmatprep.mubr.f32.mxu0 %v1346_v9 }
 0x2df   :  { %2043 = vmatprep.subr.mxu1 %v1378_v22 }
 0x2e0   :  { %2044 = vmatpush3.msra.mxu1 %v1378_v22 }
 0x2e1   :  { %2045 = vmatprep.subr.mxu1 %v1377_v35  ;;  %2109 = vmatmul.mubr.f32.gmra.mxu0 %v1347_v49 }
 0x2e2   :  { %2046 = vmatpush3.msra.mxu1 %v1377_v35  ;;  %2111 = vmatprep.mubr.f32.mxu0 %v1348_v61 }
 0x2e3   :  { %2047 = vmatprep.subr.mxu1 %v1376_v40 }
 0x2e4   :  { %2048 = vmatpush3.msra.mxu1 %v1376_v40 }
 0x2e5   :  { %2050 = vmatmul.mubr.f32.vlgmr.msra.gmra.mxu1 %v1329_v38  ;;  %2129 = vmatprep.subr.mxu1 %v2826_v11 }
 0x2e6   :  { %2145 = vmatpush3.msra.mxu1 %v2826_v11  ;;  %2052 = vmatprep.mubr.f32.mxu1 %v1330_v43 }
 0x2e7   :  { %2130 = vmatprep.subr.mxu1 %v2829_v15  ;;  %2112 = vmatmul.mubr.f32.gmra.mxu0 %v1349_v1 }
 0x2e8   :  { %2146 = vmatpush3.msra.mxu1 %v2829_v15  ;;  %2114 = vmatprep.mubr.f32.mxu0 %v1350_v46 }
 0x2e9   :  { %2053 = vmatmul.mubr.f32.gmra.mxu1 %v1331_v44  ;;  %2131 = vmatprep.subr.mxu1 %v2832_v33 }
 0x2ea   :  { %2147 = vmatpush3.msra.mxu1 %v2832_v33  ;;  %2055 = vmatprep.mubr.f32.mxu1 %v1332_v0 }
 0x2eb   :  { %2132 = vmatprep.subr.mxu1 %v2836_v30  ;;  %2115 = vmatmul.mubr.f32.gmra.mxu0 %v1351_v5 }
 0x2ec   :  { %2148 = vmatpush3.msra.mxu1 %v2836_v30 }
 0x2ed   :  { %2056 = vmatmul.mubr.f32.gmra.mxu1 %v1333_v23  ;;  %2133 = vmatprep.subr.mxu1 %v2840_v7 }
 0x2ee   :  { %2149 = vmatpush3.msra.mxu1 %v2840_v7  ;;  %2058 = vmatprep.mubr.f32.mxu1 %v1334_v50 }
 0x2ef   :  { %2134 = vmatprep.subr.mxu1 %v2844_v24 }
 0x2f0   :  { %2150 = vmatpush3.msra.mxu1 %v2844_v24 }
 0x2f1   :  { %2059 = vmatmul.mubr.f32.gmra.mxu1 %v1335_v51  ;;  %2135 = vmatprep.subr.mxu1 %v2848_v13 }
 0x2f2   :  { %2151 = vmatpush3.msra.mxu1 %v2848_v13  ;;  %2061 = vmatprep.mubr.f32.mxu1 %v1336_v47 }
 0x2f3   :  { %2136 = vmatprep.subr.mxu1 %v2852_v20 }
 0x2f4   :  { %2152 = vmatpush3.msra.mxu1 %v2852_v20 }
 0x2f5   :  { %2062 = vmatmul.mubr.f32.gmra.mxu1 %v1337_v10  ;;  %2137 = vmatprep.subr.mxu1 %v2856_v63 }
 0x2f6   :  { %2153 = vmatpush3.msra.mxu1 %v2856_v63  ;;  %2064 = vmatprep.mubr.f32.mxu1 %v1338_v34 }
 0x2f7   :  { %2138 = vmatprep.subr.mxu1 %v2860_v21 }
 0x2f8   :  { %2154 = vmatpush3.msra.mxu1 %v2860_v21 }
 0x2f9   :  { %2065 = vmatmul.mubr.f32.gmra.mxu1 %v1339_v48  ;;  %2139 = vmatprep.subr.mxu1 %v2864_v19 }
 0x2fa   :  { %2155 = vmatpush3.msra.mxu1 %v2864_v19  ;;  %2067 = vmatprep.mubr.f32.mxu1 %v1340_v52 }
 0x2fb   :  { %2140 = vmatprep.subr.mxu1 %v2868_v58 }
 0x2fc   :  { %2156 = vmatpush3.msra.mxu1 %v2868_v58 }
 0x2fd   :  { %2068 = vmatmul.mubr.f32.gmra.mxu1 %v1341_v27  ;;  %2141 = vmatprep.subr.mxu1 %v2872_v37 }
 0x2fe   :  { %2157 = vmatpush3.msra.mxu1 %v2872_v37  ;;  %2070 = vmatprep.mubr.f32.mxu1 %v1342_v45 }
 0x2ff   :  { %2142 = vmatprep.subr.mxu1 %v2876_v25 }
 0x300   :  { %2158 = vmatpush3.msra.mxu1 %v2876_v25 }
 0x301   :  { %2071 = vmatmul.mubr.f32.gmra.mxu1 %v1343_v2  ;;  %2143 = vmatprep.subr.mxu1 %v2880_v39 }
 0x302   :  { %2159 = vmatpush3.msra.mxu1 %v2880_v39  ;;  %2117 = vmatprep.mubr.f32.mxu1 %v1352_v57 }
 0x303   :  { %2144 = vmatprep.subr.mxu1 %v2884_v41 }
 0x304   :  { %2160 = vmatpush3.msra.mxu1 %v2884_v41 }
 0x305   :  { %2118 = vmatmul.mubr.f32.vlgmr.msra.gmra.mxu1 %v1353_v55 }
 0x306   :  { %2120 = vmatprep.mubr.f32.mxu1 %v1354_v53 }
 0x309   :  { %2121 = vmatmul.mubr.f32.gmra.mxu1 %v1355_v12 }
 0x30a   :  { %2123 = vmatprep.mubr.f32.mxu1 %v1356_v14 }
 0x30d   :  { %2124 = vmatmul.mubr.f32.gmra.mxu1 %v1357_v4 }
 0x30e   :  { %2126 = vmatprep.mubr.f32.mxu1 %v1358_v56 }
 0x311   :  { %2127 = vmatmul.mubr.f32.gmra.mxu1 %v1359_v60 }
 0x39d   :  { %v2107_v11 = vpop.f32.mrf.mxu0 }
 0x39f   :  { %v1603_v33 = vpop.f32.mrf.mxu0 }
 0x3a1   :  { %v2110_v7 = vpop.f32.mrf.mxu0 }
 0x3a3   :  { %v1613_v17 = vpop.f32.mrf.mxu0 }
 0x3a5   :  { %v2051_v54 = vpop.f32.mrf.mxu1 }
 0x3a6   :  { %v1609_v15 = vadd.f32 %v2107_v11, %v2051_v54 }
 0x3a7   :  { %v1458_v28 = vpop.f32.mrf.mxu1  ;;  %v2113_v26 = vpop.f32.mrf.mxu0 }
 0x3a8   :  { %v1690_v16 = vadd.f32 %v2925_v31, %v1609_v15  ;;  %v1604_v30 = vadd.f32 %v1603_v33, %v1458_v28 }
 0x3a9   :  { %v2054_v36 = vpop.f32.mrf.mxu1  ;;  %v1623_v22 = vpop.f32.mrf.mxu0 }
 0x3aa   :  { %v1722_v3 = vmin.f32 %v1690_v16, 0.0  ;;  %v1689_v24 = vadd.f32 %v2925_v31, %v1604_v30  ;;  %v1619_v8 = vadd.f32 %v2110_v7, %v2054_v36  ;;  %vm1706_vm0 = vcmp.gt.f32.partialorder %v1690_v16, 0.0 }
 0x3ab   :  { %v1468_v13 = vpop.f32.mrf.mxu1  ;;  %v2116_v62 = vpop.f32.mrf.mxu0 }
 0x3ac   :  { %v1739_v20 = vmul.f32 1.442695, %v1722_v3  ;;  %v1721_v59 = vmin.f32 %v1689_v24, 0.0  ;;  %v1692_v63 = vadd.f32 %v2925_v31, %v1619_v8  ;;  %v1614_v21 = vadd.f32 %v1613_v17, %v1468_v13 }
 0x3ad   :  { %v2057_v32 = vpop.f32.mrf.mxu1  ;;  %v1633_v44 = vpop.f32.mrf.mxu0  ;;  %vm1705_vm1 = vcmp.gt.f32.partialorder %v1689_v24, 0.0 }
 0x3ae   :  { %2181 = vpow2.f32 %v1739_v20  ;;  %v1737_v19 = vmul.f32 1.442695, %v1721_v59  ;;  %v1724_v18 = vmin.f32 %v1692_v63, 0.0  ;;  %v1691_v29 = vadd.f32 %v2925_v31, %v1614_v21 }
 0x3af   :  { %v1478_v58 = vpop.f32.mrf.mxu1  ;;  %v1629_v37 = vadd.f32 %v2113_v26, %v2057_v32  ;;  %vm1708_vm2 = vcmp.gt.f32.partialorder %v1692_v63, 0.0 }
 0x3b0   :  { %2183 = vpow2.f32 %v1737_v19  ;;  %v1743_v25 = vmul.f32 1.442695, %v1724_v18  ;;  %v1624_v35 = vadd.f32 %v1623_v22, %v1478_v58  ;;  %v1723_v40 = vmin.f32 %v1691_v29, 0.0 }
 0x3b1   :  { %v2060_v39 = vpop.f32.mrf.mxu1  ;;  %v1694_v41 = vadd.f32 %v2925_v31, %v1629_v37  ;;  %vm1707_vm3 = vcmp.gt.f32.partialorder %v1691_v29, 0.0 }
 0x3b2   :  { %2185 = vpow2.f32 %v1743_v25  ;;  %v2933_v6 = vadd.f32 %v2925_v31, %v1624_v35  ;;  %v1639_v38 = vadd.f32 %v2116_v62, %v2060_v39  ;;  %v1741_v43 = vmul.f32 1.442695, %v1723_v40 }
 0x3b3   :  { %v1488_v42 = vpop.f32.mrf.mxu1  ;;  %v1726_v9 = vmin.f32 %v1694_v41, 0.0  ;;  %vm1710_vm4 = vcmp.gt.f32.partialorder %v1694_v41, 0.0 }
 0x3b4   :  { %v1725_v49 = vmin.f32 %v2933_v6, 0.0  ;;  %v2937_v0 = vadd.f32 %v2925_v31, %v1639_v38  ;;  %v1634_v61 = vadd.f32 %v1633_v44, %v1488_v42  ;;  %2187 = vpow2.f32 %v1741_v43 }
 0x3b5   :  { %v2063_v23 = vpop.f32.mrf.mxu1  ;;  %v1747_v1 = vmul.f32 1.442695, %v1726_v9  ;;  %vm1709_vm5 = vcmp.gt.f32.partialorder %v2933_v6, 0.0 }
 0x3b6   :  { %v1745_v50 = vmul.f32 1.442695, %v1725_v49  ;;  %v1728_v46 = vmin.f32 %v2937_v0, 0.0  ;;  %v2941_v51 = vadd.f32 %v2925_v31, %v1634_v61  ;;  %vm1712_vm6 = vcmp.gt.f32.partialorder %v2937_v0, 0.0 }
 0x3b7   :  { %v1498_v5 = vpop.f32.mrf.mxu1  ;;  %2189 = vpow2.f32 %v1747_v1 }
 0x3b8   :  { %2191 = vpow2.f32 %v1745_v50  ;;  %v1751_v47 = vmul.f32 1.442695, %v1728_v46  ;;  %v1727_v10 = vmin.f32 %v2941_v51, 0.0  ;;  %vm1711_vm7 = vcmp.gt.f32.partialorder %v2941_v51, 0.0 }
 0x3b9   :  { %v2066_v34 = vpop.f32.mrf.mxu1 }
 0x3ba   :  { %2193 = vpow2.f32 %v1751_v47  ;;  %v1749_v48 = vmul.f32 1.442695, %v1727_v10 }
 0x3bb   :  { %v1508_v52 = vpop.f32.mrf.mxu1  ;;  %v2182_v27 = vpop.eup %2181 }
 0x3bc   :  { %v1850_v45 = vadd.f32 -1.0, %v2182_v27  ;;  %2195 = vpow2.f32 %v1749_v48 }
 0x3bd   :  { %v2069_v2 = vpop.f32.mrf.mxu1  ;;  %v2184_v57 = vpop.eup %2183 }
 0x3be   :  { %v1786_v55 = vsel %vm1706_vm0, %v1690_v16, %v1850_v45  ;;  %v1849_v53 = vadd.f32 -1.0, %v2184_v57 }
 0x3bf   :  { %v1518_v12 = vpop.f32.mrf.mxu1  ;;  %v2186_v14 = vpop.eup %2185  ;;  %1802 = vst [vmem:[#allocation16 + $0x8] sm:$0xff] %v1786_v55 }
 0x3c0   :  { %v1785_v4 = vsel %vm1705_vm1, %v1689_v24, %v1849_v53  ;;  %v1852_v56 = vadd.f32 -1.0, %v2186_v14 }
 0x3c1   :  { %v2072_v60 = vpop.f32.mrf.mxu1  ;;  %1801 = vst [vmem:[#allocation16] sm:$0xff] %v1785_v4  ;;  %v2188_v54 = vpop.eup %2187 }
 0x3c2   :  { %v1788_v11 = vsel %vm1708_vm2, %v1692_v63, %v1852_v56  ;;  %v1851_v28 = vadd.f32 -1.0, %v2188_v54 }
 0x3c3   :  { %v1528_v15 = vpop.f32.mrf.mxu1  ;;  %1804 = vst [vmem:[#allocation16 + $0x18] sm:$0xff] %v1788_v11 }
 0x3c4   :  { %v2190_v33 = vpop.eup %2189  ;;  %v1787_v16 = vsel %vm1707_vm3, %v1691_v29, %v1851_v28 }
 0x3c5   :  { %v2119_v30 = vpop.f32.mrf.mxu1  ;;  %v2192_v36 = vpop.eup %2191  ;;  %v1854_v7 = vadd.f32 -1.0, %v2190_v33  ;;  %1803 = vst [vmem:[#allocation16 + $0x10] sm:$0xff] %v1787_v16 }
 0x3c6   :  { %v1649_v3 = vadd.f32 %v2119_v30, %v2063_v23  ;;  %v1853_v8 = vadd.f32 -1.0, %v2192_v36 }
 0x3c7   :  { %v1643_v24 = vpop.f32.mrf.mxu1  ;;  %v2194_v13 = vpop.eup %2193  ;;  %v1790_v17 = vsel %vm1710_vm4, %v1694_v41, %v1854_v7 }
 0x3c8   :  { %v1698_v20 = vadd.f32 %v2925_v31, %v1649_v3  ;;  %v1644_v59 = vadd.f32 %v1643_v24, %v1498_v5  ;;  %1806 = vst [vmem:[#allocation16 + $0x28] sm:$0xff] %v1790_v17  ;;  %v1789_v63 = vsel %vm1709_vm5, %v2933_v6, %v1853_v8  ;;  %v1856_v32 = vadd.f32 -1.0, %v2194_v13 }
 0x3c9   :  { %v2122_v21 = vpop.f32.mrf.mxu1  ;;  %v2196_v26 = vpop.eup %2195  ;;  %1805 = vst [vmem:[#allocation16 + $0x20] sm:$0xff] %v1789_v63 }
 0x3ca   :  { %v1730_v19 = vmin.f32 %v1698_v20, 0.0  ;;  %v1697_v18 = vadd.f32 %v2925_v31, %v1644_v59  ;;  %v1659_v58 = vadd.f32 %v2122_v21, %v2066_v34  ;;  %v1792_v29 = vsel %vm1712_vm6, %v2937_v0, %v1856_v32 }
 0x3cb   :  { %v1855_v37 = vadd.f32 -1.0, %v2196_v26  ;;  %v1653_v22 = vpop.f32.mrf.mxu1  ;;  %1808 = vst [vmem:[#allocation16 + $0x38] sm:$0xff] %v1792_v29  ;;  %vm1714_vm8 = vcmp.gt.f32.partialorder %v1698_v20, 0.0 }
 0x3cc   :  { %v1755_v25 = vmul.f32 1.442695, %v1730_v19  ;;  %v1729_v35 = vmin.f32 %v1697_v18, 0.0  ;;  %v1700_v39 = vadd.f32 %v2925_v31, %v1659_v58  ;;  %v1654_v41 = vadd.f32 %v1653_v22, %v1508_v52 }
 0x3cd   :  { %v1791_v40 = vsel %vm1711_vm7, %v2941_v51, %v1855_v37  ;;  %v2125_v62 = vpop.f32.mrf.mxu1  ;;  %vm1713_vm9 = vcmp.gt.f32.partialorder %v1697_v18, 0.0 }
 0x3ce   :  { %1807 = vst [vmem:[#allocation16 + $0x30] sm:$0xff] %v1791_v40  ;;  %2197 = vpow2.f32 %v1755_v25  ;;  %v1753_v6 = vmul.f32 1.442695, %v1729_v35  ;;  %v1732_v38 = vmin.f32 %v1700_v39, 0.0  ;;  %v1699_v42 = vadd.f32 %v2925_v31, %v1654_v41 }
 0x3cf   :  { %v1669_v43 = vadd.f32 %v2125_v62, %v2069_v2  ;;  %v1663_v9 = vpop.f32.mrf.mxu1  ;;  %vm1716_vm10 = vcmp.gt.f32.partialorder %v1700_v39, 0.0 }
 0x3d0   :  { %2199 = vpow2.f32 %v1753_v6  ;;  %v1759_v44 = vmul.f32 1.442695, %v1732_v38  ;;  %v1664_v49 = vadd.f32 %v1663_v9, %v1518_v12  ;;  %v1731_v0 = vmin.f32 %v1699_v42, 0.0 }
 0x3d1   :  { %v1702_v61 = vadd.f32 %v2925_v31, %v1669_v43  ;;  %v2128_v23 = vpop.f32.mrf.mxu1  ;;  %vm1715_vm11 = vcmp.gt.f32.partialorder %v1699_v42, 0.0 }
 0x3d2   :  { %2201 = vpow2.f32 %v1759_v44  ;;  %v1701_v1 = vadd.f32 %v2925_v31, %v1664_v49  ;;  %v1679_v50 = vadd.f32 %v2128_v23, %v2072_v60  ;;  %v1757_v46 = vmul.f32 1.442695, %v1731_v0 }
 0x3d3   :  { %v1734_v51 = vmin.f32 %v1702_v61, 0.0  ;;  %v1673_v5 = vpop.f32.mrf.mxu1  ;;  %vm1718_vm12 = vcmp.gt.f32.partialorder %v1702_v61, 0.0 }
 0x3d4   :  { %v1733_v47 = vmin.f32 %v1701_v1, 0.0  ;;  %v1704_v10 = vadd.f32 %v2925_v31, %v1679_v50  ;;  %v1674_v34 = vadd.f32 %v1673_v5, %v1528_v15  ;;  %2203 = vpow2.f32 %v1757_v46 }
 0x3d5   :  { %v1763_v48 = vmul.f32 1.442695, %v1734_v51  ;;  %vm1717_vm13 = vcmp.gt.f32.partialorder %v1701_v1, 0.0 }
 0x3d6   :  { %v1761_v52 = vmul.f32 1.442695, %v1733_v47  ;;  %v1736_v27 = vmin.f32 %v1704_v10, 0.0  ;;  %v1703_v45 = vadd.f32 %v2925_v31, %v1674_v34  ;;  %vm1720_vm14 = vcmp.gt.f32.partialorder %v1704_v10, 0.0 }
 0x3d7   :  { %2205 = vpow2.f32 %v1763_v48 }
 0x3d8   :  { %2207 = vpow2.f32 %v1761_v52  ;;  %v1767_v2 = vmul.f32 1.442695, %v1736_v27  ;;  %v1735_v57 = vmin.f32 %v1703_v45, 0.0  ;;  %vm1719_vm15 = vcmp.gt.f32.partialorder %v1703_v45, 0.0 }
 0x3da   :  { %2209 = vpow2.f32 %v1767_v2  ;;  %v1765_v55 = vmul.f32 1.442695, %v1735_v57 }
 0x3db   :  { %v2198_v53 = vpop.eup %2197 }
 0x3dc   :  { %v1858_v12 = vadd.f32 -1.0, %v2198_v53  ;;  %2211 = vpow2.f32 %v1765_v55 }
 0x3dd   :  { %v2200_v14 = vpop.eup %2199 }
 0x3de   :  { %v1794_v4 = vsel %vm1714_vm8, %v1698_v20, %v1858_v12  ;;  %v1857_v56 = vadd.f32 -1.0, %v2200_v14 }
 0x3df   :  { %v2202_v60 = vpop.eup %2201  ;;  %1810 = vst [vmem:[#allocation16 + $0x48] sm:$0xff] %v1794_v4 }
 0x3e0   :  { %v1793_v54 = vsel %vm1713_vm9, %v1697_v18, %v1857_v56  ;;  %v1860_v11 = vadd.f32 -1.0, %v2202_v60 }
 0x3e1   :  { %1809 = vst [vmem:[#allocation16 + $0x40] sm:$0xff] %v1793_v54  ;;  %v2204_v31 = vpop.eup %2203 }
 0x3e2   :  { %v1796_v15 = vsel %vm1716_vm10, %v1700_v39, %v1860_v11  ;;  %v1859_v28 = vadd.f32 -1.0, %v2204_v31 }
 0x3e3   :  { %1812 = vst [vmem:[#allocation16 + $0x58] sm:$0xff] %v1796_v15 }
 0x3e4   :  { %v2206_v33 = vpop.eup %2205  ;;  %v1795_v36 = vsel %vm1715_vm11, %v1699_v42, %v1859_v28 }
 0x3e5   :  { %v2208_v30 = vpop.eup %2207  ;;  %v1862_v16 = vadd.f32 -1.0, %v2206_v33  ;;  %1811 = vst [vmem:[#allocation16 + $0x50] sm:$0xff] %v1795_v36 }
 0x3e6   :  { %v1861_v7 = vadd.f32 -1.0, %v2208_v30 }
 0x3e7   :  { %v2210_v3 = vpop.eup %2209  ;;  %v1798_v8 = vsel %vm1718_vm12, %v1702_v61, %v1862_v16 }
 0x3e8   :  { %1814 = vst [vmem:[#allocation16 + $0x68] sm:$0xff] %v1798_v8  ;;  %v1797_v24 = vsel %vm1717_vm13, %v1701_v1, %v1861_v7  ;;  %v1864_v13 = vadd.f32 -1.0, %v2210_v3 }
 0x3e9   :  { %v2212_v17 = vpop.eup %2211  ;;  %1813 = vst [vmem:[#allocation16 + $0x60] sm:$0xff] %v1797_v24 }
 0x3ea   :  { %v1800_v20 = vsel %vm1720_vm14, %v1704_v10, %v1864_v13  ;;  %v1863_v59 = vadd.f32 -1.0, %v2212_v17 }
 0x3eb   :  { %1816 = vst [vmem:[#allocation16 + $0x78] sm:$0xff] %v1800_v20 }
 0x3ec   :  { %v1799_v63 = vsel %vm1719_vm15, %v1703_v45, %v1863_v59 }
 0x3ed   :  { %1815 = vst [vmem:[#allocation16 + $0x70] sm:$0xff] %v1799_v63 }
 0x3ee   :  { %2344 = shalt.err (!%p2341_p7)
}
 0x3ef   :  { %1828 = dma.vmem_to_hbm [thread:$0]  %s1823_s18, 2048, %s2972_s8, [#allocation7], %s2373_s10, %s2373_s10, %s2374_s11  }
 0x3f0   :  { %2365 = dma.done.wait [#allocation7], 2048  }
 0x3f1   :  { %2366 = vsyncadd [#allocation7], 4294965248 }
 0x3f2   :  { %1832 = vsyncpa [#allocation6], 1 }
 0x3f3   :  { %1833 = vsyncpa [#allocation9], 1 }
 0x3f4   :  { %1834 = vsyncpa [#allocation12], 1 }
 0x3f5   :  { %1835 = vsyncpa [#allocation15], 1 }
 0x3f6   :  { %1836 = vsyncpa [#allocation7], 1 }

</bundles_post_ra>
